<compile_context>
chip_gen: v6e
topology: v6e:2x2x1
jax: 0.10.0
libtpu: 0.0.40
codegen_flags: <defaults>
</compile_context>

<pallas_src>
import jax
import jax.numpy as jnp
import numpy as np
from jax.experimental import pallas as pl
from jax.experimental.pallas import tpu as pltpu


# ------------------------------- Kernel ---------------------------------------
def _decoder_kernel(x_ref, wxt_ref, beff_ref, seg_ref, segt_ref, g_ref, w1_ref,
                    bf_ref, o_ref):
    # x_ref   : (TN, 40)     varying part of the fc1 input (z1 part folded into beff)
    # wxt_ref : (40, 1000)   fc1 weight columns acting on x, pre-transposed
    # beff_ref: (1, 1000)    fc1 bias with the constant z1 @ Wz^T term folded in
    # seg_ref : (1000, 20)   0/1 segment-membership matrix
    # segt_ref: (20, 1000)   Seg^T (broadcast per-segment scalars back to lanes)
    # g_ref   : (1000, 50)   wfused[k]-weighted block-diagonal fold matrix
    # w1_ref  : (50, 784)
    # bf_ref  : (1, 1)       fused conv bias (SMEM scalar)
    # o_ref   : (TN, 784)
    x = x_ref[...]                                                     # (TN, 40)

    # fc1 (lane-dense, one MXU matmul over all 1000 outputs)
    h = jnp.dot(x, wxt_ref[...],
                preferred_element_type=jnp.float32) + beff_ref[...]    # (TN, 1000)

    # Stabilize: one global row max + floor at -60 so every segment sum stays > 0.
    h = h - jnp.max(h, axis=-1, keepdims=True)
    e = jnp.exp(jnp.maximum(h, -60.0))                                 # dense EUP

    # Segmented softmax bookkeeping on the MXU (instead of 40 XLU lane reductions).
    seg_sum = jnp.dot(e, seg_ref[...],
                      preferred_element_type=jnp.float32)              # (TN, 20)
    inv = pl.reciprocal(seg_sum, approx=True)                          # EUP
    inv_b = jnp.dot(inv, segt_ref[...],
                    preferred_element_type=jnp.float32)                # (TN, 1000)
    s = e * inv_b                                                      # softmax(dim=2), flattened

    # Fold the 1x1-conv chain (wfused already inside G), then project with w1.
    q = jnp.dot(s, g_ref[...], preferred_element_type=jnp.float32)     # (TN, 50)
    y = jnp.dot(q, w1_ref[...],
                preferred_element_type=jnp.float32) + bf_ref[0, 0]     # (TN, 784)
    o_ref[...] = jax.nn.sigmoid(y)


# ------------------------- One-time param preparation --------------------------
def prepare_params(p):
    """Batch-invariant algebraic folds. Call once per parameter set."""
    wd1 = p["wd1"]                                   # (1000, 1040) fc1.weight
    bd1 = p["bd1"]                                   # (1000,)      fc1.bias
    z1 = p["z1"]                                     # (1, 1000)

    wx = wd1[:, :40]                                 # acts on the real input x
    wz = wd1[:, 40:]                                 # acts on the constant z1
    beff = bd1[None, :] + z1 @ wz.T                  # (1, 1000) constant term folded in
    wxt = wx.T                                       # (40, 1000) lane-dense matmul RHS

    # Collapse the 1x1-conv chain: conv1 o conv == (wfused, bfused)
    wc = p["wconv"].reshape(50, 20)
    wc1 = p["wconv1"].reshape(1, 50)
    wf = (wc1 @ wc).reshape(20)                      # (20,)
    bf = wc1 @ p["bconv"].reshape(50, 1) + p["bconv1"].reshape(1, 1)   # (1, 1) scalar

    # Segment matrices: fc1 output c = 50*k + j belongs to segment k, slot j.
    eye20 = jnp.eye(20, dtype=jnp.float32)
    seg = jnp.repeat(eye20, 50, axis=0)              # (1000, 20), Seg[50k+j, k] = 1
    segt = seg.T                                     # (20, 1000)
    g = jnp.kron(wf.reshape(20, 1),
                 jnp.eye(50, dtype=jnp.float32))     # (1000, 50), G[50k+j, j] = wf[k]

    return {"wxt": wxt, "beff": beff, "seg": seg, "segt": segt, "g": g,
            "w1": p["w1"], "bf": bf.astype(jnp.float32)}


# --------------------------------- Wrapper -------------------------------------
def _round_up(n, m):
    return ((n + m - 1) // m) * m


def decoder_forward(x, prep, block_n=512):
    N = x.shape[0]
    # Batch tile: multiple of 8, capped at 512 (v7x 64 MiB VMEM friendly).
    TN = min(block_n, _round_up(max(N, 1), 8))
    Np = _round_up(N, TN)
    if Np != N:
        x = jnp.pad(x, ((0, Np - N), (0, 0)))        # pad tail rows with zeros

    def resident(a):                                  # weights: DMA once, stay in VMEM
        zeros = (0,) * a.ndim
        return pl.BlockSpec(a.shape, lambda i: zeros)

    in_specs = [
        pl.BlockSpec((TN, 40), lambda i: (i, 0)),     # x tile (pipelined per step)
        resident(prep["wxt"]),
        resident(prep["beff"]),
        resident(prep["seg"]),
        resident(prep["segt"]),
        resident(prep["g"]),
        resident(prep["w1"]),
        pl.BlockSpec(memory_space=pltpu.MemorySpace.SMEM),   # bfused scalar
    ]

    out = pl.pallas_call(
        _decoder_kernel,
        out_shape=jax.ShapeDtypeStruct((Np, 784), jnp.float32),
        grid=(Np // TN,),
        in_specs=in_specs,
        out_specs=pl.BlockSpec((TN, 784), lambda i: (i, 0)),
        compiler_params=pltpu.CompilerParams(
            dimension_semantics=("parallel",),        # batch rows are independent
            vmem_limit_bytes=32 << 20),               # ~10 MiB actual at TN=512
    )(x, prep["wxt"], prep["beff"], prep["seg"], prep["segt"],
      prep["g"], prep["w1"], prep["bf"])

    if Np != N:
        out = out[:N]
    return out.reshape(N, 1, 784)                     # match torch Conv1d output (N, 1, 784)


# ----------------------------- Pure-JAX reference ------------------------------
def decoder_forward_ref(x, p):
    N = x.shape[0]
    xc = jnp.concatenate([x, jnp.tile(p["z1"], (N, 1))], axis=1)      # (N, 1040)
    h1 = xc @ p["wd1"].T + p["bd1"]
    s = jax.nn.softmax(h1.reshape(N, 20, 50), axis=2)
    t = s @ p["w1"]                                                   # (N, 20, 784)
    c1 = jnp.einsum("oi,nil->nol", p["wconv"].reshape(50, 20), t) + p["bconv"][None, :, None]
    c2 = jnp.einsum("oi,nil->nol", p["wconv1"].reshape(1, 50), c1) + p["bconv1"][None, :, None]
    return jax.nn.sigmoid(c2)                                         # (N, 1, 784)


# -------------------------------- Param init ------------------------------------
def init_params(key):
    ks = jax.random.split(key, 8)
    u = lambda k, shape, bound: jax.random.uniform(
        k, shape, jnp.float32, minval=-bound, maxval=bound)
    return {
        "wd1": u(ks[0], (1000, 1040), 1.0 / np.sqrt(1040.0)),        # fc1
        "bd1": u(ks[1], (1000,), 1.0 / np.sqrt(1040.0)),
        "w1": jax.random.uniform(ks[2], (50, 784), jnp.float32),     # torch.rand
        "z1": jax.random.uniform(ks[3], (1, 1000), jnp.float32),     # torch.rand
        "wconv": u(ks[4], (50, 20, 1), 1.0 / np.sqrt(20.0)),         # Conv1d(20, 50, 1)
        "bconv": u(ks[5], (50,), 1.0 / np.sqrt(20.0)),
        "wconv1": u(ks[6], (1, 50, 1), 1.0 / np.sqrt(50.0)),         # Conv1d(50, 1, 1)
        "bconv1": u(ks[7], (1,), 1.0 / np.sqrt(50.0)),
    }


if __name__ == "__main__":
    key = jax.random.PRNGKey(0)
    kp, kx = jax.random.split(key)
    params = init_params(kp)
    prep = prepare_params(params)                    # one-time folding of constants

    N = 2
    x = jax.random.normal(kx, (N, 40), jnp.float32)  # fc1 expects 40 + 1000(z1) = 1040 cols

    out = decoder_forward(x, prep)
    out = jax.block_until_ready(out)

    out_ref = decoder_forward_ref(x, params)
    # Tolerance covers TPU default (bf16-pass) matmul precision + approx reciprocal.
    np.testing.assert_allclose(np.asarray(out), np.asarray(out_ref), atol=3e-3, rtol=3e-3)
    assert out.shape == (N, 1, 784)

    print("KERNEL_OK")
</pallas_src>

<mosaic_0001>
module attributes {stable_mosaic.version = 11 : i64} {
  func.func @_decoder_kernel(%arg0: i32, %arg1: memref<8x40xf32, #tpu.memory_space<vmem>>, %arg2: memref<40x1000xf32, #tpu.memory_space<vmem>>, %arg3: memref<1x1000xf32, #tpu.memory_space<vmem>>, %arg4: memref<1000x20xf32, #tpu.memory_space<vmem>>, %arg5: memref<20x1000xf32, #tpu.memory_space<vmem>>, %arg6: memref<1000x50xf32, #tpu.memory_space<vmem>>, %arg7: memref<50x784xf32, #tpu.memory_space<vmem>>, %arg8: memref<1x1xf32, #tpu.memory_space<smem>>, %arg9: memref<8x784xf32, #tpu.memory_space<vmem>>) attributes {dimension_semantics = [#tpu.dimension_semantics<parallel>], iteration_bounds = array<i64: 1>, scalar_prefetch = 0 : i64, scratch_operands = 0 : i64, tpu.core_type = #tpu.core_type<tc>, window_params = [{transform_indices = @transform_0, window_bounds = array<i64: 8, 40>}, {pipeline_mode = #tpu.pipeline_mode<synchronous>, transform_indices = @transform_1, window_bounds = array<i64: 40, 1000>}, {pipeline_mode = #tpu.pipeline_mode<synchronous>, transform_indices = @transform_2, window_bounds = array<i64: 1, 1000>}, {pipeline_mode = #tpu.pipeline_mode<synchronous>, transform_indices = @transform_3, window_bounds = array<i64: 1000, 20>}, {pipeline_mode = #tpu.pipeline_mode<synchronous>, transform_indices = @transform_4, window_bounds = array<i64: 20, 1000>}, {pipeline_mode = #tpu.pipeline_mode<synchronous>, transform_indices = @transform_5, window_bounds = array<i64: 1000, 50>}, {pipeline_mode = #tpu.pipeline_mode<synchronous>, transform_indices = @transform_6, window_bounds = array<i64: 50, 784>}, {transform_indices = @transform_7, window_bounds = array<i64: 1, 1>}, {transform_indices = @transform_8, window_bounds = array<i64: 8, 784>}]} {
    %c0 = arith.constant 0 : index
    %c0_0 = arith.constant 0 : index
    %0 = vector.load %arg1[%c0, %c0_0] : memref<8x40xf32, #tpu.memory_space<vmem>>, vector<8x40xf32>
    %c0_1 = arith.constant 0 : index
    %c0_2 = arith.constant 0 : index
    %1 = vector.load %arg2[%c0_1, %c0_2] : memref<40x1000xf32, #tpu.memory_space<vmem>>, vector<40x1000xf32>
    %cst = arith.constant dense<0.000000e+00> : vector<8x1000xf32>
    %2 = tpu.matmul %0, %1, %cst {dimension_numbers = #tpu.dot_dimension_numbers<[1], [0], [0], [1], [0, 0, 1, 1], [], []>} : vector<8x40xf32>, vector<40x1000xf32>, vector<8x1000xf32> -> vector<8x1000xf32>
    %c0_3 = arith.constant 0 : index
    %c0_4 = arith.constant 0 : index
    %3 = vector.load %arg3[%c0_3, %c0_4] : memref<1x1000xf32, #tpu.memory_space<vmem>>, vector<1x1000xf32>
    %4 = vector.broadcast %3 : vector<1x1000xf32> to vector<8x1000xf32>
    %5 = arith.addf %2, %4 : vector<8x1000xf32>
    %cst_5 = arith.constant dense<0xFF800000> : vector<8xf32>
    %6 = vector.multi_reduction <maximumf>, %5, %cst_5 [1] : vector<8x1000xf32> to vector<8xf32>
    %7 = vector.shape_cast %6 : vector<8xf32> to vector<8x1xf32>
    %8 = vector.broadcast %7 : vector<8x1xf32> to vector<8x1000xf32>
    %9 = arith.subf %5, %8 : vector<8x1000xf32>
    %cst_6 = arith.constant -6.000000e+01 : f32
    %10 = vector.broadcast %cst_6 : f32 to vector<8x1000xf32>
    %11 = arith.maximumf %9, %10 : vector<8x1000xf32>
    %12 = math.exp %11 : vector<8x1000xf32>
    %c0_7 = arith.constant 0 : index
    %c0_8 = arith.constant 0 : index
    %13 = vector.load %arg4[%c0_7, %c0_8] : memref<1000x20xf32, #tpu.memory_space<vmem>>, vector<1000x20xf32>
    %cst_9 = arith.constant dense<0.000000e+00> : vector<8x20xf32>
    %14 = tpu.matmul %12, %13, %cst_9 {dimension_numbers = #tpu.dot_dimension_numbers<[1], [0], [0], [1], [0, 0, 1, 1], [], []>} : vector<8x1000xf32>, vector<1000x20xf32>, vector<8x20xf32> -> vector<8x20xf32>
    %15 = tpu.reciprocal %14 {approx = true} : vector<8x20xf32> -> vector<8x20xf32>
    %c0_10 = arith.constant 0 : index
    %c0_11 = arith.constant 0 : index
    %16 = vector.load %arg5[%c0_10, %c0_11] : memref<20x1000xf32, #tpu.memory_space<vmem>>, vector<20x1000xf32>
    %cst_12 = arith.constant dense<0.000000e+00> : vector<8x1000xf32>
    %17 = tpu.matmul %15, %16, %cst_12 {dimension_numbers = #tpu.dot_dimension_numbers<[1], [0], [0], [1], [0, 0, 1, 1], [], []>} : vector<8x20xf32>, vector<20x1000xf32>, vector<8x1000xf32> -> vector<8x1000xf32>
    %18 = arith.mulf %12, %17 : vector<8x1000xf32>
    %c0_13 = arith.constant 0 : index
    %c0_14 = arith.constant 0 : index
    %19 = vector.load %arg6[%c0_13, %c0_14] : memref<1000x50xf32, #tpu.memory_space<vmem>>, vector<1000x50xf32>
    %cst_15 = arith.constant dense<0.000000e+00> : vector<8x50xf32>
    %20 = tpu.matmul %18, %19, %cst_15 {dimension_numbers = #tpu.dot_dimension_numbers<[1], [0], [0], [1], [0, 0, 1, 1], [], []>} : vector<8x1000xf32>, vector<1000x50xf32>, vector<8x50xf32> -> vector<8x50xf32>
    %c0_16 = arith.constant 0 : index
    %c0_17 = arith.constant 0 : index
    %21 = vector.load %arg7[%c0_16, %c0_17] : memref<50x784xf32, #tpu.memory_space<vmem>>, vector<50x784xf32>
    %cst_18 = arith.constant dense<0.000000e+00> : vector<8x784xf32>
    %22 = tpu.matmul %20, %21, %cst_18 {dimension_numbers = #tpu.dot_dimension_numbers<[1], [0], [0], [1], [0, 0, 1, 1], [], []>} : vector<8x50xf32>, vector<50x784xf32>, vector<8x784xf32> -> vector<8x784xf32>
    %c0_19 = arith.constant 0 : index
    %c0_20 = arith.constant 0 : index
    %23 = memref.load %arg8[%c0_19, %c0_20] : memref<1x1xf32, #tpu.memory_space<smem>>
    %24 = vector.broadcast %23 : f32 to vector<8x784xf32>
    %25 = arith.addf %22, %24 : vector<8x784xf32>
    %26 = arith.negf %25 : vector<8x784xf32>
    %27 = math.exp %26 : vector<8x784xf32>
    %cst_21 = arith.constant 1.000000e+00 : f32
    %28 = vector.broadcast %cst_21 : f32 to vector<8x784xf32>
    %29 = arith.addf %28, %27 : vector<8x784xf32>
    %30 = arith.divf %28, %29 : vector<8x784xf32>
    %c0_22 = arith.constant 0 : index
    %c0_23 = arith.constant 0 : index
    %31 = vector.load %arg9[%c0_22, %c0_23] : memref<8x784xf32, #tpu.memory_space<vmem>>, vector<8x784xf32>
    tpu.vector_store %arg9[%c0_22, %c0_23], %30 {strides = array<i32>} : memref<8x784xf32, #tpu.memory_space<vmem>>, vector<8x784xf32>,
    return
  }
  func.func @transform_0(%arg0: i32) -> (i32, i32) {
    %c0_i32 = arith.constant 0 : i32
    %c0_i32_0 = arith.constant 0 : i32
    return %arg0, %c0_i32 : i32, i32
  }
  func.func @transform_1(%arg0: i32) -> (i32, i32) {
    %c0_i32 = arith.constant 0 : i32
    %c0_i32_0 = arith.constant 0 : i32
    %c0_i32_1 = arith.constant 0 : i32
    return %c0_i32, %c0_i32_0 : i32, i32
  }
  func.func @transform_2(%arg0: i32) -> (i32, i32) {
    %c0_i32 = arith.constant 0 : i32
    %c0_i32_0 = arith.constant 0 : i32
    %c0_i32_1 = arith.constant 0 : i32
    return %c0_i32, %c0_i32_0 : i32, i32
  }
  func.func @transform_3(%arg0: i32) -> (i32, i32) {
    %c0_i32 = arith.constant 0 : i32
    %c0_i32_0 = arith.constant 0 : i32
    %c0_i32_1 = arith.constant 0 : i32
    return %c0_i32, %c0_i32_0 : i32, i32
  }
  func.func @transform_4(%arg0: i32) -> (i32, i32) {
    %c0_i32 = arith.constant 0 : i32
    %c0_i32_0 = arith.constant 0 : i32
    %c0_i32_1 = arith.constant 0 : i32
    return %c0_i32, %c0_i32_0 : i32, i32
  }
  func.func @transform_5(%arg0: i32) -> (i32, i32) {
    %c0_i32 = arith.constant 0 : i32
    %c0_i32_0 = arith.constant 0 : i32
    %c0_i32_1 = arith.constant 0 : i32
    return %c0_i32, %c0_i32_0 : i32, i32
  }
  func.func @transform_6(%arg0: i32) -> (i32, i32) {
    %c0_i32 = arith.constant 0 : i32
    %c0_i32_0 = arith.constant 0 : i32
    %c0_i32_1 = arith.constant 0 : i32
    return %c0_i32, %c0_i32_0 : i32, i32
  }
  func.func @transform_7(%arg0: i32) -> (i32, i32) {
    %c0_i32 = arith.constant 0 : i32
    %c0_i32_0 = arith.constant 0 : i32
    %c0_i32_1 = arith.constant 0 : i32
    return %c0_i32, %c0_i32_0 : i32, i32
  }
  func.func @transform_8(%arg0: i32) -> (i32, i32) {
    %c0_i32 = arith.constant 0 : i32
    %c0_i32_0 = arith.constant 0 : i32
    return %arg0, %c0_i32 : i32, i32
  }
}

</mosaic_0001>

<bundles_post_ra>
// kernel: tpu_custom_call.1
= control target key start
LH: loop header
LB: loop body
LE: loop exit
PB: predicated region body
PF: predicated region fallthrough
CT: control target
= control target key end

     0   :  { %vm114_vm0 = vcmask 326656   ;;  %v2373_v21 = vmov 0.0   ;;  %s3709_s0 = inlined_call_operand.vmem [shape: f32[8,40], index: 0, kind: input, shape index: {}]   ;;  %s3710_s1 = inlined_call_operand.vmem [shape: f32[40,1000], index: 1, kind: input, shape index: {}]   ;;  %s3711_s2 = inlined_call_operand.vmem [shape: f32[1,1000], index: 2, kind: input, shape index: {}]   ;;  %s3712_s3 = inlined_call_operand.vmem [shape: f32[1000,20], index: 3, kind: input, shape index: {}]   ;;  %s3713_s4 = inlined_call_operand.vmem [shape: f32[20,1000], index: 4, kind: input, shape index: {}]   ;;  %s3714_s5 = inlined_call_operand.vmem [shape: f32[1000,50], index: 5, kind: input, shape index: {}]   ;;  %s3715_s6 = inlined_call_operand.vmem [shape: f32[50,784], index: 6, kind: input, shape index: {}]   ;;  %s3716_s7 = inlined_call_operand.<no memory space> [shape: f32[1,1], index: 7, kind: input, shape index: {}]   ;;  %s3717_s8 = inlined_call_operand.hbm [shape: f32[8,784], index: 8, kind: output, shape index: {}]  }
   0x1   :  { %v65_v0 = vld [vmem:[%s3710_s1 + $0x108] sm:$0xff]  ;;  %v67_v1 = vld [vmem:[%s3710_s1 + $0x118] sm:$0xff]  ;;  %v64_v2 = vld [vmem:[%s3710_s1 + $0x100] sm:$0xff]  ;;  %182 = vmatprep.mubr.f32.mxu0 %v2373_v21  ;;  %253 = vmatprep.mubr.f32.mxu1 %v2373_v21 }
   0x2   :  { %140 = vmatprep.subr.mxu0 %v65_v0  ;;  %211 = vmatprep.subr.mxu1 %v67_v1  ;;  %v66_v3 = vld [vmem:[%s3710_s1 + $0x110] sm:$0xff]  ;;  %v57_v4 = vld [vmem:[%s3710_s1 + $0xc8] sm:$0xff]  ;;  %v59_v5 = vld [vmem:[%s3710_s1 + $0xd8] sm:$0xff] }
   0x3   :  { %141 = vmatpush1.msra.mxu0 %v64_v2  ;;  %212 = vmatpush1.msra.mxu1 %v66_v3  ;;  %v56_v6 = vld [vmem:[%s3710_s1 + $0xc0] sm:$0xff]  ;;  %v58_v7 = vld [vmem:[%s3710_s1 + $0xd0] sm:$0xff]  ;;  %v49_v8 = vld [vmem:[%s3710_s1 + $0x88] sm:$0xff] }
   0x4   :  { %142 = vmatprep.subr.mxu0 %v57_v4  ;;  %213 = vmatprep.subr.mxu1 %v59_v5  ;;  %v51_v9 = vld [vmem:[%s3710_s1 + $0x98] sm:$0xff]  ;;  %v48_v10 = vld [vmem:[%s3710_s1 + $0x80] sm:$0xff]  ;;  %v50_v11 = vld [vmem:[%s3710_s1 + $0x90] sm:$0xff] }
   0x5   :  { %143 = vmatpush1.msra.mxu0 %v56_v6  ;;  %214 = vmatpush1.msra.mxu1 %v58_v7  ;;  %v41_v12 = vld [vmem:[%s3710_s1 + $0x48] sm:$0xff]  ;;  %v43_v13 = vld [vmem:[%s3710_s1 + $0x58] sm:$0xff]  ;;  %v40_v14 = vld [vmem:[%s3710_s1 + $0x40] sm:$0xff] }
   0x6   :  { %144 = vmatprep.subr.mxu0 %v49_v8  ;;  %215 = vmatprep.subr.mxu1 %v51_v9  ;;  %v42_v15 = vld [vmem:[%s3710_s1 + $0x50] sm:$0xff]  ;;  %v33_v16 = vld [vmem:[%s3710_s1 + $0x8] sm:$0xff]  ;;  %v35_v17 = vld [vmem:[%s3710_s1 + $0x18] sm:$0xff] }
   0x7   :  { %145 = vmatpush1.msra.mxu0 %v48_v10  ;;  %216 = vmatpush1.msra.mxu1 %v50_v11  ;;  %v32_v18 = vld [vmem:[%s3710_s1] sm:$0xff]  ;;  %v34_v19 = vld [vmem:[%s3710_s1 + $0x10] sm:$0xff]  ;;  %v69_v22 = vld [vmem:[%s3710_s1 + $0x128] sm:$0xff] }
   0x8   :  { %146 = vmatprep.subr.mxu0 %v41_v12  ;;  %217 = vmatprep.subr.mxu1 %v43_v13  ;;  %v31_v20 = vld [vmem:[%s3709_s0] sm:$0xff]  ;;  %v71_v23 = vld [vmem:[%s3710_s1 + $0x138] sm:$0xff]  ;;  %v70_v25 = vld [vmem:[%s3710_s1 + $0x130] sm:$0xff] }
   0x9   :  { %147 = vmatpush1.msra.mxu0 %v40_v14  ;;  %218 = vmatpush1.msra.mxu1 %v42_v15  ;;  %v68_v24 = vld [vmem:[%s3710_s1 + $0x120] sm:$0xff]  ;;  %v61_v26 = vld [vmem:[%s3710_s1 + $0xe8] sm:$0xff]  ;;  %v63_v27 = vld [vmem:[%s3710_s1 + $0xf8] sm:$0xff] }
   0xa   :  { %148 = vmatprep.subr.mxu0 %v33_v16  ;;  %219 = vmatprep.subr.mxu1 %v35_v17  ;;  %v60_v28 = vld [vmem:[%s3710_s1 + $0xe0] sm:$0xff]  ;;  %v62_v29 = vld [vmem:[%s3710_s1 + $0xf0] sm:$0xff]  ;;  %v53_v30 = vld [vmem:[%s3710_s1 + $0xa8] sm:$0xff] }
   0xb   :  { %149 = vmatpush1.msra.mxu0 %v32_v18  ;;  %220 = vmatpush1.msra.mxu1 %v34_v19  ;;  %v55_v31 = vld [vmem:[%s3710_s1 + $0xb8] sm:$0xff] }
   0xc   :  { %2031 = vmatmul.mubr.msk.f32.vlgmr.msra.gmra.mxu0 %vm114_vm0, %v31_v20  ;;  %2032 = vmatmul.mubr.msk.f32.vlgmr.msra.gmra.mxu1 %vm114_vm0, %v31_v20 }
   0xd   :  { %282 = vmatprep.subr.mxu0 %v69_v22  ;;  %353 = vmatprep.subr.mxu1 %v71_v23 }
   0xe   :  { %283 = vmatpush1.msra.mxu0 %v68_v24  ;;  %354 = vmatpush1.msra.mxu1 %v70_v25 }
   0xf   :  { %14 = vsyncpa [#allocation4], 0  ;;  %284 = vmatprep.subr.mxu0 %v61_v26  ;;  %355 = vmatprep.subr.mxu1 %v63_v27  ;;  %v52_v32 = vld [vmem:[%s3710_s1 + $0xa0] sm:$0xff]  ;;  %v54_v33 = vld [vmem:[%s3710_s1 + $0xb0] sm:$0xff]  ;;  %v74_v0 = vlaneseq  ;;  %vm405_vm1 = vcmask 850944   ;;  %vm882_vm2 = vcmask 1043456  }
  0x10   :  { %285 = vmatpush1.msra.mxu0 %v60_v28  ;;  %356 = vmatpush1.msra.mxu1 %v62_v29  ;;  %v45_v34 = vld [vmem:[%s3710_s1 + $0x68] sm:$0xff]  ;;  %v47_v35 = vld [vmem:[%s3710_s1 + $0x78] sm:$0xff]  ;;  %v44_v36 = vld [vmem:[%s3710_s1 + $0x60] sm:$0xff]  ;;  %vm878_vm3 = vcmask 162816   ;;  %vm1662_vm4 = vcmask 1041408   ;;  %vm2374_vm5 = vmmov 0  }
  0x11   :  { %286 = vmatprep.subr.mxu0 %v53_v30  ;;  %357 = vmatprep.subr.mxu1 %v55_v31  ;;  %v46_v37 = vld [vmem:[%s3710_s1 + $0x70] sm:$0xff]  ;;  %v37_v38 = vld [vmem:[%s3710_s1 + $0x28] sm:$0xff]  ;;  %v39_v39 = vld [vmem:[%s3710_s1 + $0x38] sm:$0xff]  ;;  %v75_v1 = vshrl.u32 %v74_v0, 7  ;;  %vm1658_vm6 = vcmask 408576   ;;  %vm2015_vm7 = vcmask 130048  }
  0x12   :  { %287 = vmatpush1.msra.mxu0 %v52_v32  ;;  %358 = vmatpush1.msra.mxu1 %v54_v33  ;;  %v36_v40 = vld [vmem:[%s3710_s1 + $0x20] sm:$0xff]  ;;  %v38_v41 = vld [vmem:[%s3710_s1 + $0x30] sm:$0xff]  ;;  %v476_v42 = vld [vmem:[%s3712_s3 + $0xf8] sm:$0xff] }
  0x13   :  { %288 = vmatprep.subr.mxu0 %v45_v34  ;;  %359 = vmatprep.subr.mxu1 %v47_v35  ;;  %v508_v43 = vld [vmem:[%s3712_s3 + $0x1f8] sm:$0xff]  ;;  %v475_v46 = vld [vmem:[%s3712_s3 + $0xf0] sm:$0xff]  ;;  %v474_v50 = vld [vmem:[%s3712_s3 + $0xe8] sm:$0xff]  ;;  %v92_v2 = vsub.s32 4, %v75_v1  ;;  %v100_v5 = vsub.s32 6, %v75_v1  ;;  %v76_v6 = vsub.s32 0, %v75_v1 }
  0x14   :  { %289 = vmatpush1.msra.mxu0 %v44_v36  ;;  %360 = vmatpush1.msra.mxu1 %v46_v37  ;;  %v460_v44 = vld [vmem:[%s3712_s3 + $0x78] sm:$0xff]  ;;  %v507_v47 = vld [vmem:[%s3712_s3 + $0x1f0] sm:$0xff]  ;;  %v506_v51 = vld [vmem:[%s3712_s3 + $0x1e8] sm:$0xff]  ;;  %v80_v7 = vsub.s32 1, %v75_v1  ;;  %v96_v8 = vsub.s32 5, %v75_v1  ;;  %v104_v9 = vsub.s32 7, %v75_v1 }
  0x15   :  { %290 = vmatprep.subr.mxu0 %v37_v38  ;;  %361 = vmatprep.subr.mxu1 %v39_v39  ;;  %v492_v45 = vld [vmem:[%s3712_s3 + $0x178] sm:$0xff]  ;;  %v459_v48 = vld [vmem:[%s3712_s3 + $0x70] sm:$0xff]  ;;  %v458_v52 = vld [vmem:[%s3712_s3 + $0x68] sm:$0xff]  ;;  %v84_v11 = vsub.s32 2, %v75_v1  ;;  %v88_v12 = vsub.s32 3, %v75_v1 }
  0x16   :  { %291 = vmatpush1.msra.mxu0 %v36_v40  ;;  %324 = vmatprep.mubr.f32.mxu0 %v2373_v21  ;;  %v491_v49 = vld [vmem:[%s3712_s3 + $0x170] sm:$0xff]  ;;  %v490_v53 = vld [vmem:[%s3712_s3 + $0x168] sm:$0xff]  ;;  %v473_v54 = vld [vmem:[%s3712_s3 + $0xe0] sm:$0xff] }
  0x17   :  { %362 = vmatpush1.msra.mxu1 %v38_v41  ;;  %395 = vmatprep.mubr.f32.mxu1 %v2373_v21  ;;  %v505_v55 = vld [vmem:[%s3712_s3 + $0x1e0] sm:$0xff]  ;;  %v472_v58 = vld [vmem:[%s3712_s3 + $0xd8] sm:$0xff]  ;;  %v471_v62 = vld [vmem:[%s3712_s3 + $0xd0] sm:$0xff] }
  0x18   :  { %2033 = vmatmul.mubr.msk.f32.vlgmr.msra.gmra.mxu0 %vm114_vm0, %v31_v20  ;;  %2034 = vmatmul.mubr.msk.f32.vlgmr.msra.gmra.mxu1 %vm114_vm0, %v31_v20  ;;  %v457_v56 = vld [vmem:[%s3712_s3 + $0x60] sm:$0xff]  ;;  %v504_v59 = vld [vmem:[%s3712_s3 + $0x1d8] sm:$0xff]  ;;  %v503_v63 = vld [vmem:[%s3712_s3 + $0x1d0] sm:$0xff] }
  0x19   :  { %2067 = vmatprep.subr.mxu0 %v476_v42  ;;  %2102 = vmatprep.subr.mxu1 %v508_v43  ;;  %v489_v57 = vld [vmem:[%s3712_s3 + $0x160] sm:$0xff]  ;;  %v456_v60 = vld [vmem:[%s3712_s3 + $0x58] sm:$0xff]  ;;  %v450_v0 = vld [vmem:[%s3712_s3 + $0x28] sm:$0xff] }
  0x1a   :  { %2068 = vmatpush3.msra.mxu0 %v460_v44  ;;  %2103 = vmatpush3.msra.mxu1 %v492_v45  ;;  %v488_v61 = vld [vmem:[%s3712_s3 + $0x158] sm:$0xff]  ;;  %v72_v10 = vld [vmem:[%s3711_s2] sm:$0xff]  ;;  %v455_v44 = vld [vmem:[%s3712_s3 + $0x50] sm:$0xff] }
  0x1b   :  { %2069 = vmatprep.subr.mxu0 %v475_v46  ;;  %2104 = vmatprep.subr.mxu1 %v507_v47  ;;  %v93_v13 = vrot.slane %v72_v10, %v92_v2  ;;  %v101_v16 = vrot.slane %v72_v10, %v100_v5  ;;  %v77_v17 = vrot.slane %v72_v10, %v76_v6  ;;  %v487_v45 = vld [vmem:[%s3712_s3 + $0x150] sm:$0xff]  ;;  %v470_v46 = vld [vmem:[%s3712_s3 + $0xc8] sm:$0xff]  ;;  %v465_v2 = vld [vmem:[%s3712_s3 + $0xa0] sm:$0xff] }
  0x1c   :  { %2070 = vmatpush3.msra.mxu0 %v459_v48  ;;  %2105 = vmatpush3.msra.mxu1 %v491_v49  ;;  %v81_v18 = vrot.slane %v72_v10, %v80_v7  ;;  %v97_v19 = vrot.slane %v72_v10, %v96_v8  ;;  %v105_v20 = vrot.slane %v72_v10, %v104_v9  ;;  %v502_v47 = vld [vmem:[%s3712_s3 + $0x1c8] sm:$0xff]  ;;  %v481_v5 = vld [vmem:[%s3712_s3 + $0x120] sm:$0xff]  ;;  %v464_v6 = vld [vmem:[%s3712_s3 + $0x98] sm:$0xff] }
  0x1d   :  { %2071 = vmatprep.subr.mxu0 %v474_v50  ;;  %2106 = vmatprep.subr.mxu1 %v506_v51  ;;  %v85_v22 = vrot.slane %v72_v10, %v84_v11  ;;  %v89_v23 = vrot.slane %v72_v10, %v88_v12  ;;  %v454_v48 = vld [vmem:[%s3712_s3 + $0x48] sm:$0xff]  ;;  %v469_v50 = vld [vmem:[%s3712_s3 + $0xc0] sm:$0xff]  ;;  %v496_v7 = vld [vmem:[%s3712_s3 + $0x198] sm:$0xff] }
  0x1e   :  { %2072 = vmatpush3.msra.mxu0 %v458_v52  ;;  %2107 = vmatpush3.msra.mxu1 %v490_v53  ;;  %v486_v49 = vld [vmem:[%s3712_s3 + $0x148] sm:$0xff]  ;;  %v501_v51 = vld [vmem:[%s3712_s3 + $0x1c0] sm:$0xff]  ;;  %v448_v8 = vld [vmem:[%s3712_s3 + $0x18] sm:$0xff] }
  0x1f   :  { %2073 = vmatprep.subr.mxu0 %v473_v54  ;;  %2108 = vmatprep.subr.mxu1 %v505_v55  ;;  %v453_v52 = vld [vmem:[%s3712_s3 + $0x40] sm:$0xff]  ;;  %v468_v54 = vld [vmem:[%s3712_s3 + $0xb8] sm:$0xff]  ;;  %v482_v1 = vld [vmem:[%s3712_s3 + $0x128] sm:$0xff] }
  0x20   :  { %2074 = vmatpush3.msra.mxu0 %v457_v56  ;;  %2109 = vmatpush3.msra.mxu1 %v489_v57  ;;  %v485_v53 = vld [vmem:[%s3712_s3 + $0x140] sm:$0xff]  ;;  %v500_v55 = vld [vmem:[%s3712_s3 + $0x1b8] sm:$0xff]  ;;  %v463_v10 = vld [vmem:[%s3712_s3 + $0x90] sm:$0xff] }
  0x21   :  { %2075 = vmatprep.subr.mxu0 %v472_v58  ;;  %2110 = vmatprep.subr.mxu1 %v504_v59  ;;  %v452_v56 = vld [vmem:[%s3712_s3 + $0x38] sm:$0xff]  ;;  %v467_v58 = vld [vmem:[%s3712_s3 + $0xb0] sm:$0xff] }
  0x22   :  { %2076 = vmatpush3.msra.mxu0 %v456_v60  ;;  %2111 = vmatpush3.msra.mxu1 %v488_v61  ;;  %v484_v57 = vld [vmem:[%s3712_s3 + $0x138] sm:$0xff]  ;;  %v499_v59 = vld [vmem:[%s3712_s3 + $0x1b0] sm:$0xff] }
  0x23   :  { %2077 = vmatprep.subr.mxu0 %v471_v62  ;;  %2112 = vmatprep.subr.mxu1 %v503_v63  ;;  %v451_v60 = vld [vmem:[%s3712_s3 + $0x30] sm:$0xff]  ;;  %v466_v62 = vld [vmem:[%s3712_s3 + $0xa8] sm:$0xff]  ;;  %v480_v9 = vld [vmem:[%s3712_s3 + $0x118] sm:$0xff] }
  0x24   :  { %2078 = vmatpush3.msra.mxu0 %v455_v44  ;;  %2113 = vmatpush3.msra.mxu1 %v487_v45  ;;  %v483_v61 = vld [vmem:[%s3712_s3 + $0x130] sm:$0xff]  ;;  %v498_v63 = vld [vmem:[%s3712_s3 + $0x1a8] sm:$0xff] }
  0x25   :  { %2079 = vmatprep.subr.mxu0 %v470_v46  ;;  %2114 = vmatprep.subr.mxu1 %v502_v47  ;;  %v495_v11 = vld [vmem:[%s3712_s3 + $0x190] sm:$0xff]  ;;  %v524_v47 = vld [vmem:[%s3712_s3 + $0x278] sm:$0xff] }
  0x26   :  { %2080 = vmatpush3.msra.mxu0 %v454_v48  ;;  %2115 = vmatpush3.msra.mxu1 %v486_v49  ;;  %v447_v12 = vld [vmem:[%s3712_s3 + $0x10] sm:$0xff] }
  0x27   :  { %2081 = vmatprep.subr.mxu0 %v469_v50  ;;  %2116 = vmatprep.subr.mxu1 %v501_v51  ;;  %v539_v49 = vld [vmem:[%s3712_s3 + $0x2f0] sm:$0xff]  ;;  %v556_v51 = vld [vmem:[%s3712_s3 + $0x378] sm:$0xff] }
  0x28   :  { %2082 = vmatpush3.msra.mxu0 %v453_v52  ;;  %2117 = vmatpush3.msra.mxu1 %v485_v53  ;;  %v523_v52 = vld [vmem:[%s3712_s3 + $0x270] sm:$0xff] }
  0x29   :  { %2083 = vmatprep.subr.mxu0 %v468_v54  ;;  %2118 = vmatprep.subr.mxu1 %v500_v55  ;;  %v555_v54 = vld [vmem:[%s3712_s3 + $0x370] sm:$0xff]  ;;  %v538_v55 = vld [vmem:[%s3712_s3 + $0x2e8] sm:$0xff] }
  0x2a   :  { %2084 = vmatpush3.msra.mxu0 %v452_v56  ;;  %2119 = vmatpush3.msra.mxu1 %v484_v57  ;;  %v522_v57 = vld [vmem:[%s3712_s3 + $0x268] sm:$0xff] }
  0x2b   :  { %2085 = vmatprep.subr.mxu0 %v467_v58  ;;  %2120 = vmatprep.subr.mxu1 %v499_v59  ;;  %v554_v58 = vld [vmem:[%s3712_s3 + $0x368] sm:$0xff]  ;;  %v537_v59 = vld [vmem:[%s3712_s3 + $0x2e0] sm:$0xff] }
  0x2c   :  { %2086 = vmatpush3.msra.mxu0 %v451_v60  ;;  %2121 = vmatpush3.msra.mxu1 %v483_v61  ;;  %v521_v60 = vld [vmem:[%s3712_s3 + $0x260] sm:$0xff] }
  0x2d   :  { %2087 = vmatprep.subr.mxu0 %v466_v62  ;;  %2122 = vmatprep.subr.mxu1 %v498_v63  ;;  %v553_v61 = vld [vmem:[%s3712_s3 + $0x360] sm:$0xff]  ;;  %v536_v62 = vld [vmem:[%s3712_s3 + $0x2d8] sm:$0xff] }
  0x2e   :  { %2088 = vmatpush3.msra.mxu0 %v450_v0  ;;  %2123 = vmatpush3.msra.mxu1 %v482_v1  ;;  %v520_v0 = vld [vmem:[%s3712_s3 + $0x258] sm:$0xff] }
  0x2f   :  { %2089 = vmatprep.subr.mxu0 %v465_v2  ;;  %v552_v1 = vld [vmem:[%s3712_s3 + $0x358] sm:$0xff]  ;;  %v535_v2 = vld [vmem:[%s3712_s3 + $0x2d0] sm:$0xff] }
  0xcc   :  { %v184_v3 = vpop.f32.mrf.mxu0  ;;  %v255_v4 = vpop.f32.mrf.mxu1 }
  0xcd   :  { %v2625_v30 = vadd.f32 %v184_v3, %v77_v17  ;;  %v2633_v34 = vadd.f32 %v255_v4, %v85_v22  ;;  %v497_v3 = vld [vmem:[%s3712_s3 + $0x1a0] sm:$0xff]  ;;  %v478_v17 = vld [vmem:[%s3712_s3 + $0x108] sm:$0xff] }
  0xce   :  { %v186_v14 = vpop.f32.mrf.mxu0  ;;  %v257_v15 = vpop.f32.mrf.mxu1  ;;  %v449_v4 = vld [vmem:[%s3712_s3 + $0x20] sm:$0xff]  ;;  %2124 = vmatprep.subr.mxu1 %v497_v3  ;;  %v551_v3 = vld [vmem:[%s3712_s3 + $0x350] sm:$0xff] }
  0xcf   :  { %v2627_v31 = vadd.f32 %v186_v14, %v81_v18  ;;  %v2635_v35 = vadd.f32 %v257_v15, %v89_v23  ;;  %2090 = vmatpush3.msra.mxu0 %v449_v4  ;;  %2125 = vmatpush3.msra.mxu1 %v481_v5  ;;  %v462_v14 = vld [vmem:[%s3712_s3 + $0x88] sm:$0xff]  ;;  %v461_v18 = vld [vmem:[%s3712_s3 + $0x80] sm:$0xff]  ;;  %v540_v23 = vld [vmem:[%s3712_s3 + $0x2f8] sm:$0xff] }
  0xd0   :  { %2091 = vmatprep.subr.mxu0 %v464_v6  ;;  %2126 = vmatprep.subr.mxu1 %v496_v7  ;;  %v494_v15 = vld [vmem:[%s3712_s3 + $0x188] sm:$0xff]  ;;  %v477_v22 = vld [vmem:[%s3712_s3 + $0x100] sm:$0xff] }
  0xd1   :  { %2092 = vmatpush3.msra.mxu0 %v448_v8  ;;  %2127 = vmatpush3.msra.mxu1 %v480_v9  ;;  %v534_v4 = vld [vmem:[%s3712_s3 + $0x2c8] sm:$0xff]  ;;  %v533_v8 = vld [vmem:[%s3712_s3 + $0x2c0] sm:$0xff] }
  0xd2   :  { %2093 = vmatprep.subr.mxu0 %v463_v10  ;;  %2128 = vmatprep.subr.mxu1 %v495_v11  ;;  %v518_v6 = vld [vmem:[%s3712_s3 + $0x248] sm:$0xff]  ;;  %v517_v9 = vld [vmem:[%s3712_s3 + $0x240] sm:$0xff]  ;;  %v532_v11 = vld [vmem:[%s3712_s3 + $0x2b8] sm:$0xff] }
  0xd3   :  { %2094 = vmatpush3.msra.mxu0 %v447_v12  ;;  %v550_v7 = vld [vmem:[%s3712_s3 + $0x348] sm:$0xff]  ;;  %v549_v10 = vld [vmem:[%s3712_s3 + $0x340] sm:$0xff] }
  0xd4   :  { %2095 = vmatprep.subr.mxu0 %v462_v14  ;;  %v548_v14 = vld [vmem:[%s3712_s3 + $0x338] sm:$0xff] }
  0xd8   :  { %v326_v24 = vpop.f32.mrf.mxu0  ;;  %v397_v25 = vpop.f32.mrf.mxu1 }
  0xd9   :  { %v2621_v26 = vadd.f32 %v326_v24, %v93_v13  ;;  %v2623_v27 = vadd.f32 %v397_v25, %v101_v16  ;;  %v479_v13 = vld [vmem:[%s3712_s3 + $0x110] sm:$0xff]  ;;  %v446_v16 = vld [vmem:[%s3712_s3 + $0x8] sm:$0xff] }
  0xda   :  { %v328_v28 = vpop.f32.mrf.mxu0  ;;  %v399_v29 = vpop.f32.mrf.mxu1  ;;  %2129 = vmatpush3.msra.mxu1 %v479_v13  ;;  %2096 = vmatpush3.msra.mxu0 %v446_v16  ;;  %v516_v13 = vld [vmem:[%s3712_s3 + $0x238] sm:$0xff]  ;;  %v515_v16 = vld [vmem:[%s3712_s3 + $0x230] sm:$0xff] }
  0xdb   :  { %v2629_v32 = vadd.f32 %v328_v28, %v97_v19  ;;  %v2631_v33 = vadd.f32 %v399_v29, %v105_v20  ;;  %v402_v36 = vmax.f32 %v2625_v30, %v2621_v26  ;;  %v404_v39 = vmax.f32 %v2633_v34, %v2623_v27  ;;  %v493_v19 = vld [vmem:[%s3712_s3 + $0x180] sm:$0xff]  ;;  %2130 = vmatprep.subr.mxu1 %v494_v15  ;;  %v531_v15 = vld [vmem:[%s3712_s3 + $0x2b0] sm:$0xff] }
  0xdc   :  { %v445_v20 = vld [vmem:[%s3712_s3] sm:$0xff]  ;;  %2131 = vmatpush3.msra.mxu1 %v478_v17  ;;  %2097 = vmatprep.subr.mxu0 %v461_v18  ;;  %v547_v17 = vld [vmem:[%s3712_s3 + $0x330] sm:$0xff]  ;;  %v530_v18 = vld [vmem:[%s3712_s3 + $0x2a8] sm:$0xff] }
  0xdd   :  { %v403_v37 = vmax.f32 %v2627_v31, %v2629_v32  ;;  %v406_v38 = vsel %vm405_vm1, %v2631_v33, -inf  ;;  %2132 = vmatprep.subr.mxu1 %v493_v19  ;;  %2098 = vmatpush3.msra.mxu0 %v445_v20  ;;  %v514_v19 = vld [vmem:[%s3712_s3 + $0x228] sm:$0xff] }
  0xde   :  { %v407_v40 = vmax.f32 %v2635_v35, %v406_v38  ;;  %2133 = vmatpush3.msra.mxu1 %v477_v22  ;;  %2137 = vmatprep.subr.mxu0 %v540_v23  ;;  %v546_v20 = vld [vmem:[%s3712_s3 + $0x328] sm:$0xff]  ;;  %v529_v22 = vld [vmem:[%s3712_s3 + $0x2a0] sm:$0xff] }
  0xdf   :  { %v408_v41 = vmax.f32 %v402_v36, %v403_v37  ;;  %783 = vmatprep.subr.mxu1 %v2373_v21  ;;  %v513_v23 = vld [vmem:[%s3712_s3 + $0x220] sm:$0xff] }
  0xe0   :  { %v409_v42 = vmax.f32 %v404_v39, %v407_v40 }
  0xe2   :  { %v410_v43 = vmax.f32 %v408_v41, %v409_v42 }
  0xe4   :  { %411 = vmax.xlane.f32.xlu0 %v410_v43 }
 0x16d   :  { %v2776_v24 = vpop.xlane.xlu0 %411 }
 0x16e   :  { %v413_v25 = vsub.f32 %v2625_v30, %v2776_v24  ;;  %v414_v28 = vsub.f32 %v2627_v31, %v2776_v24  ;;  %v415_v29 = vsub.f32 %v2633_v34, %v2776_v24  ;;  %v416_v36 = vsub.f32 %v2635_v35, %v2776_v24 }
 0x16f   :  { %v418_v37 = vsub.f32 %v2629_v32, %v2776_v24  ;;  %v420_v38 = vsub.f32 %v2631_v33, %v2776_v24  ;;  %v417_v63 = vsub.f32 %v2621_v26, %v2776_v24  ;;  %v519_v26 = vld [vmem:[%s3712_s3 + $0x250] sm:$0xff] }
 0x170   :  { %v421_v39 = vmax.f32 %v413_v25, -60.0  ;;  %v422_v40 = vmax.f32 %v414_v28, -60.0  ;;  %v423_v41 = vmax.f32 %v415_v29, -60.0  ;;  %v424_v42 = vmax.f32 %v416_v36, -60.0  ;;  %v545_v25 = vld [vmem:[%s3712_s3 + $0x320] sm:$0xff]  ;;  %v528_v28 = vld [vmem:[%s3712_s3 + $0x298] sm:$0xff] }
 0x171   :  { %v426_v30 = vmax.f32 %v418_v37, -60.0  ;;  %v428_v45 = vmax.f32 %v420_v38, -60.0  ;;  %v425_v5 = vmax.f32 %v417_v63, -60.0  ;;  %v512_v29 = vld [vmem:[%s3712_s3 + $0x218] sm:$0xff]  ;;  %v527_v37 = vld [vmem:[%s3712_s3 + $0x290] sm:$0xff] }
 0x172   :  { %v429_v43 = vmul.f32 1.442695, %v421_v39  ;;  %v431_v44 = vmul.f32 1.442695, %v422_v40  ;;  %v433_v31 = vmul.f32 1.442695, %v423_v41 }
 0x173   :  { %v435_v46 = vmul.f32 1.442695, %v424_v42  ;;  %v439_v34 = vmul.f32 1.442695, %v426_v30  ;;  %v443_v35 = vmul.f32 1.442695, %v428_v45 }
 0x174   :  { %2305 = vpow2.f32 %v429_v43  ;;  %v437_v12 = vmul.f32 1.442695, %v425_v5  ;;  %v544_v36 = vld [vmem:[%s3712_s3 + $0x318] sm:$0xff]  ;;  %v511_v38 = vld [vmem:[%s3712_s3 + $0x210] sm:$0xff]  ;;  %v526_v40 = vld [vmem:[%s3712_s3 + $0x288] sm:$0xff] }
 0x175   :  { %2307 = vpow2.f32 %v431_v44  ;;  %v543_v39 = vld [vmem:[%s3712_s3 + $0x310] sm:$0xff]  ;;  %v510_v41 = vld [vmem:[%s3712_s3 + $0x208] sm:$0xff]  ;;  %v525_v30 = vld [vmem:[%s3712_s3 + $0x280] sm:$0xff] }
 0x176   :  { %2309 = vpow2.f32 %v433_v31  ;;  %v542_v42 = vld [vmem:[%s3712_s3 + $0x308] sm:$0xff]  ;;  %v509_v43 = vld [vmem:[%s3712_s3 + $0x200] sm:$0xff]  ;;  %v1246_v5 = vld [vmem:[%s3714_s5 + $0x178] sm:$0xff] }
 0x177   :  { %2311 = vpow2.f32 %v435_v46  ;;  %v541_v44 = vld [vmem:[%s3712_s3 + $0x300] sm:$0xff]  ;;  %v419_v46 = vsub.f32 %v2623_v27, %v2776_v24  ;;  %v566_v27 = vld [vmem:[%s3712_s3 + $0x3c8] sm:$0xff] }
 0x178   :  { %2313 = vpow2.f32 %v439_v34  ;;  %v569_v31 = vld [vmem:[%s3712_s3 + $0x3e0] sm:$0xff]  ;;  %v568_v34 = vld [vmem:[%s3712_s3 + $0x3d8] sm:$0xff] }
 0x179   :  { %2315 = vpow2.f32 %v443_v35  ;;  %v567_v35 = vld [vmem:[%s3712_s3 + $0x3d0] sm:$0xff]  ;;  %v565_v24 = vld [vmem:[%s3712_s3 + $0x3c0] sm:$0xff] }
 0x17a   :  { %2317 = vpow2.f32 %v437_v12  ;;  %v870_v63 = vld [vmem:[%s3713_s4 + $0x80] sm:$0xf]  ;;  %v1258_v12 = vld [vmem:[%s3714_s5 + $0x1d8] sm:$0xff] }
 0x181   :  { %v2790_v32 = vpop.eup %2305 }
 0x182   :  { %v2792_v33 = vpop.eup %2307 }
 0x183   :  { %v2797_v48 = vpop.eup %2309  ;;  %637 = vmatprep.mubr.f32.mxu0 %v2792_v33 }
 0x184   :  { %v2803_v50 = vpop.eup %2311  ;;  %638 = vmatmul.mubr.f32.vlgmr.msra.gmra.mxu0 %v2790_v32 }
 0x185   :  { %707 = vmatprep.mubr.f32.mxu1 %v2803_v50  ;;  %2138 = vmatpush3.msra.mxu0 %v524_v47  ;;  %v2813_v53 = vpop.eup %2313  ;;  %v427_v47 = vmax.f32 %v419_v46, -60.0 }
 0x186   :  { %708 = vmatmul.mubr.f32.vlgmr.msra.gmra.mxu1 %v2797_v48  ;;  %2139 = vmatprep.subr.mxu0 %v539_v49  ;;  %v2823_v56 = vpop.eup %2315 }
 0x187   :  { %784 = vmatpush1.msra.mxu1 %v556_v51  ;;  %777 = vmatprep.mubr.f32.mxu0 %v2813_v53  ;;  %v2970_v45 = vpop.eup %2317  ;;  %v441_v49 = vmul.f32 1.442695, %v427_v47  ;;  %v564_v51 = vld [vmem:[%s3712_s3 + $0x3b8] sm:$0xff]  ;;  %v872_v47 = vld [vmem:[%s3713_s4 + $0x90] sm:$0xf] }
 0x188   :  { %785 = vmatprep.subr.mxu1 %v2373_v21  ;;  %2140 = vmatpush3.msra.mxu0 %v523_v52  ;;  %v563_v52 = vld [vmem:[%s3712_s3 + $0x3b0] sm:$0xff] }
 0x189   :  { %2035 = vmatprep.mubr.msk.f32.mxu1 %vm405_vm1, %v2823_v56  ;;  %786 = vmatpush1.msra.mxu1 %v555_v54  ;;  %2319 = vpow2.f32 %v441_v49  ;;  %v562_v54 = vld [vmem:[%s3712_s3 + $0x3a8] sm:$0xff]  ;;  %v864_v49 = vld [vmem:[%s3713_s4 + $0x50] sm:$0xff] }
 0x18a   :  { %2141 = vmatprep.subr.mxu0 %v538_v55  ;;  %787 = vmatprep.subr.mxu1 %v2373_v21  ;;  %v561_v55 = vld [vmem:[%s3712_s3 + $0x3a0] sm:$0xff] }
 0x18b   :  { %2142 = vmatpush3.msra.mxu0 %v522_v57  ;;  %788 = vmatpush1.msra.mxu1 %v554_v58  ;;  %v560_v57 = vld [vmem:[%s3712_s3 + $0x398] sm:$0xff]  ;;  %v559_v58 = vld [vmem:[%s3712_s3 + $0x390] sm:$0xff] }
 0x18c   :  { %2143 = vmatprep.subr.mxu0 %v537_v59  ;;  %789 = vmatprep.subr.mxu1 %v2373_v21  ;;  %v558_v59 = vld [vmem:[%s3712_s3 + $0x388] sm:$0xff] }
 0x18d   :  { %2144 = vmatpush3.msra.mxu0 %v521_v60  ;;  %790 = vmatpush1.msra.mxu1 %v553_v61  ;;  %v557_v60 = vld [vmem:[%s3712_s3 + $0x380] sm:$0xff] }
 0x18e   :  { %2145 = vmatprep.subr.mxu0 %v536_v62  ;;  %791 = vmatprep.subr.mxu1 %v2373_v21  ;;  %v871_v62 = vld [vmem:[%s3713_s4 + $0x88] sm:$0xf] }
 0x18f   :  { %2146 = vmatpush3.msra.mxu0 %v520_v0  ;;  %792 = vmatpush1.msra.mxu1 %v552_v1  ;;  %v863_v0 = vld [vmem:[%s3713_s4 + $0x48] sm:$0xff]  ;;  %v862_v1 = vld [vmem:[%s3713_s4 + $0x40] sm:$0xff] }
 0x190   :  { %2147 = vmatprep.subr.mxu0 %v535_v2  ;;  %793 = vmatprep.subr.mxu1 %v2373_v21  ;;  %v855_v2 = vld [vmem:[%s3713_s4 + $0x8] sm:$0xff] }
 0x191   :  { %2148 = vmatpush3.msra.mxu0 %v519_v26  ;;  %794 = vmatpush1.msra.mxu1 %v551_v3  ;;  %v854_v26 = vld [vmem:[%s3713_s4] sm:$0xff]  ;;  %v873_v3 = vld [vmem:[%s3713_s4 + $0x98] sm:$0xf] }
 0x192   :  { %2149 = vmatprep.subr.mxu0 %v534_v4  ;;  %795 = vmatprep.subr.mxu1 %v2373_v21  ;;  %v1262_v4 = vld [vmem:[%s3714_s5 + $0x1f8] sm:$0xff] }
 0x193   :  { %2150 = vmatpush3.msra.mxu0 %v518_v6  ;;  %796 = vmatpush1.msra.mxu1 %v550_v7  ;;  %v1261_v6 = vld [vmem:[%s3714_s5 + $0x1f0] sm:$0xff] }
 0x194   :  { %2151 = vmatprep.subr.mxu0 %v533_v8  ;;  %797 = vmatprep.subr.mxu1 %v2373_v21  ;;  %v1245_v7 = vld [vmem:[%s3714_s5 + $0x170] sm:$0xff]  ;;  %v1260_v8 = vld [vmem:[%s3714_s5 + $0x1e8] sm:$0xff] }
 0x195   :  { %2152 = vmatpush3.msra.mxu0 %v517_v9  ;;  %798 = vmatpush1.msra.mxu1 %v549_v10  ;;  %v1244_v9 = vld [vmem:[%s3714_s5 + $0x168] sm:$0xff]  ;;  %v1259_v10 = vld [vmem:[%s3714_s5 + $0x1e0] sm:$0xff] }
 0x196   :  { %2153 = vmatprep.subr.mxu0 %v532_v11  ;;  %799 = vmatprep.subr.mxu1 %v2373_v21  ;;  %v3025_v61 = vpop.eup %2319  ;;  %v1243_v11 = vld [vmem:[%s3714_s5 + $0x160] sm:$0xff] }
 0x197   :  { %2154 = vmatpush3.msra.mxu0 %v516_v13  ;;  %800 = vmatpush1.msra.mxu1 %v548_v14  ;;  %v1242_v13 = vld [vmem:[%s3714_s5 + $0x158] sm:$0xff]  ;;  %v1257_v14 = vld [vmem:[%s3714_s5 + $0x1d0] sm:$0xff] }
 0x198   :  { %2155 = vmatprep.subr.mxu0 %v531_v15  ;;  %801 = vmatprep.subr.mxu1 %v2373_v21  ;;  %v1241_v15 = vld [vmem:[%s3714_s5 + $0x150] sm:$0xff] }
 0x199   :  { %2156 = vmatpush3.msra.mxu0 %v515_v16  ;;  %802 = vmatpush1.msra.mxu1 %v547_v17  ;;  %v1256_v16 = vld [vmem:[%s3714_s5 + $0x1c8] sm:$0xff] }
 0x19a   :  { %2157 = vmatprep.subr.mxu0 %v530_v18  ;;  %803 = vmatprep.subr.mxu1 %v2373_v21  ;;  %v1240_v17 = vld [vmem:[%s3714_s5 + $0x148] sm:$0xff]  ;;  %v1255_v18 = vld [vmem:[%s3714_s5 + $0x1c0] sm:$0xff] }
 0x19b   :  { %2158 = vmatpush3.msra.mxu0 %v514_v19  ;;  %804 = vmatpush1.msra.mxu1 %v546_v20  ;;  %v1239_v19 = vld [vmem:[%s3714_s5 + $0x140] sm:$0xff]  ;;  %v1254_v20 = vld [vmem:[%s3714_s5 + $0x1b8] sm:$0xff] }
 0x19c   :  { %2159 = vmatprep.subr.mxu0 %v529_v22  ;;  %805 = vmatprep.subr.mxu1 %v2373_v21  ;;  %v1238_v22 = vld [vmem:[%s3714_s5 + $0x138] sm:$0xff] }
 0x19d   :  { %2160 = vmatpush3.msra.mxu0 %v513_v23  ;;  %806 = vmatpush1.msra.mxu1 %v545_v25  ;;  %v1253_v23 = vld [vmem:[%s3714_s5 + $0x1b0] sm:$0xff] }
 0x19e   :  { %2161 = vmatprep.subr.mxu0 %v528_v28  ;;  %807 = vmatprep.subr.mxu1 %v2373_v21  ;;  %v1237_v25 = vld [vmem:[%s3714_s5 + $0x130] sm:$0xff]  ;;  %v1252_v28 = vld [vmem:[%s3714_s5 + $0x1a8] sm:$0xff] }
 0x19f   :  { %2162 = vmatpush3.msra.mxu0 %v512_v29  ;;  %808 = vmatpush1.msra.mxu1 %v544_v36  ;;  %v1236_v29 = vld [vmem:[%s3714_s5 + $0x128] sm:$0xff] }
 0x1a0   :  { %2163 = vmatprep.subr.mxu0 %v527_v37  ;;  %809 = vmatprep.subr.mxu1 %v2373_v21 }
 0x1a1   :  { %2164 = vmatpush3.msra.mxu0 %v511_v38  ;;  %810 = vmatpush1.msra.mxu1 %v543_v39 }
 0x1a2   :  { %2165 = vmatprep.subr.mxu0 %v526_v40  ;;  %811 = vmatprep.subr.mxu1 %v2373_v21 }
 0x1a3   :  { %2166 = vmatpush3.msra.mxu0 %v510_v41  ;;  %812 = vmatpush1.msra.mxu1 %v542_v42 }
 0x1a4   :  { %2167 = vmatprep.subr.mxu0 %v525_v30  ;;  %813 = vmatprep.subr.mxu1 %v2373_v21 }
 0x1a5   :  { %2168 = vmatpush3.msra.mxu0 %v509_v43  ;;  %814 = vmatpush1.msra.mxu1 %v541_v44 }
 0x1a6   :  { %778 = vmatmul.mubr.f32.vlgmr.msra.gmra.mxu0 %v2970_v45  ;;  %821 = vmatprep.subr.mxu1 %v2373_v21 }
 0x1a7   :  { %822 = vmatpush2.msra.mxu1 %v569_v31  ;;  %971 = vmatprep.mubr.f32.mxu0 %v2373_v21 }
 0x1a8   :  { %823 = vmatprep.subr.mxu1 %v2373_v21  ;;  %2036 = vmatprep.subr.msk.mxu0 %vm882_vm2, %v871_v62  ;;  %v877_v62 = vld [vmem:[%s3713_s4 + $0xb8] sm:$0xf] }
 0x1a9   :  { %824 = vmatpush2.msra.mxu1 %v568_v34  ;;  %2037 = vmatpush1.msk.msra.mxu0 %vm882_vm2, %v870_v63  ;;  %v876_v63 = vld [vmem:[%s3713_s4 + $0xb0] sm:$0xf] }
 0x1aa   :  { %825 = vmatprep.subr.mxu1 %v2373_v21  ;;  %935 = vmatprep.subr.mxu0 %v863_v0  ;;  %v869_v0 = vld [vmem:[%s3713_s4 + $0x78] sm:$0xff] }
 0x1ab   :  { %826 = vmatpush2.msra.mxu1 %v567_v35  ;;  %936 = vmatpush1.msra.mxu0 %v862_v1  ;;  %v868_v1 = vld [vmem:[%s3713_s4 + $0x70] sm:$0xff] }
 0x1ac   :  { %827 = vmatprep.subr.mxu1 %v2373_v21  ;;  %937 = vmatprep.subr.mxu0 %v855_v2  ;;  %v861_v2 = vld [vmem:[%s3713_s4 + $0x38] sm:$0xff] }
 0x1ad   :  { %828 = vmatpush2.msra.mxu1 %v566_v27  ;;  %938 = vmatpush1.msra.mxu0 %v854_v26  ;;  %v860_v26 = vld [vmem:[%s3713_s4 + $0x30] sm:$0xff] }
 0x1ae   :  { %829 = vmatprep.subr.mxu1 %v2373_v21  ;;  %2039 = vmatprep.subr.msk.mxu0 %vm882_vm2, %v873_v3  ;;  %v1230_v3 = vld [vmem:[%s3714_s5 + $0xf8] sm:$0xff] }
 0x1af   :  { %830 = vmatpush2.msra.mxu1 %v565_v24  ;;  %v865_v24 = vld [vmem:[%s3713_s4 + $0x58] sm:$0xff] }
 0x1b0   :  { %831 = vmatprep.subr.mxu1 %v2373_v21 }
 0x1b1   :  { %832 = vmatpush2.msra.mxu1 %v564_v51  ;;  %v857_v51 = vld [vmem:[%s3713_s4 + $0x18] sm:$0xff] }
 0x1b2   :  { %833 = vmatprep.subr.mxu1 %v2373_v21 }
 0x1b3   :  { %834 = vmatpush2.msra.mxu1 %v563_v52  ;;  %v856_v52 = vld [vmem:[%s3713_s4 + $0x10] sm:$0xff] }
 0x1b4   :  { %835 = vmatprep.subr.mxu1 %v2373_v21 }
 0x1b5   :  { %836 = vmatpush2.msra.mxu1 %v562_v54  ;;  %v875_v54 = vld [vmem:[%s3713_s4 + $0xa8] sm:$0xf] }
 0x1b6   :  { %837 = vmatprep.subr.mxu1 %v2373_v21 }
 0x1b7   :  { %838 = vmatpush2.msra.mxu1 %v561_v55  ;;  %v874_v55 = vld [vmem:[%s3713_s4 + $0xa0] sm:$0xf] }
 0x1b8   :  { %839 = vmatprep.subr.mxu1 %v2373_v21 }
 0x1b9   :  { %840 = vmatpush2.msra.mxu1 %v560_v57  ;;  %v867_v57 = vld [vmem:[%s3713_s4 + $0x68] sm:$0xff] }
 0x1ba   :  { %841 = vmatprep.subr.mxu1 %v2373_v21 }
 0x1bb   :  { %842 = vmatpush2.msra.mxu1 %v559_v58  ;;  %v866_v58 = vld [vmem:[%s3713_s4 + $0x60] sm:$0xff] }
 0x1bc   :  { %843 = vmatprep.subr.mxu1 %v2373_v21 }
 0x1bd   :  { %844 = vmatpush2.msra.mxu1 %v558_v59  ;;  %v859_v59 = vld [vmem:[%s3713_s4 + $0x28] sm:$0xff] }
 0x1be   :  { %845 = vmatprep.subr.mxu1 %v2373_v21 }
 0x1bf   :  { %846 = vmatpush2.msra.mxu1 %v557_v60  ;;  %v858_v60 = vld [vmem:[%s3713_s4 + $0x20] sm:$0xff] }
 0x1c0   :  { %848 = vmatmul.mubr.f32.vlgmr.msra.gmra.mxu1 %v3025_v61  ;;  %2207 = vmatprep.subr.mxu1 %v1262_v4  ;;  %v1214_v4 = vld [vmem:[%s3714_s5 + $0x78] sm:$0xff] }
 0x1c1   :  { %2208 = vmatpush3.msra.mxu1 %v1246_v5  ;;  %v1229_v5 = vld [vmem:[%s3714_s5 + $0xf0] sm:$0xff] }
 0x1c2   :  { %2209 = vmatprep.subr.mxu1 %v1261_v6  ;;  %v1213_v6 = vld [vmem:[%s3714_s5 + $0x70] sm:$0xff] }
 0x1c3   :  { %2210 = vmatpush3.msra.mxu1 %v1245_v7  ;;  %v1228_v7 = vld [vmem:[%s3714_s5 + $0xe8] sm:$0xff] }
 0x1c4   :  { %2211 = vmatprep.subr.mxu1 %v1260_v8  ;;  %v1212_v8 = vld [vmem:[%s3714_s5 + $0x68] sm:$0xff] }
 0x1c5   :  { %2212 = vmatpush3.msra.mxu1 %v1244_v9  ;;  %v1227_v9 = vld [vmem:[%s3714_s5 + $0xe0] sm:$0xff] }
 0x1c6   :  { %2213 = vmatprep.subr.mxu1 %v1259_v10  ;;  %v1211_v10 = vld [vmem:[%s3714_s5 + $0x60] sm:$0xff] }
 0x1c7   :  { %2214 = vmatpush3.msra.mxu1 %v1243_v11  ;;  %v1226_v11 = vld [vmem:[%s3714_s5 + $0xd8] sm:$0xff] }
 0x1c8   :  { %2215 = vmatprep.subr.mxu1 %v1258_v12  ;;  %v1210_v12 = vld [vmem:[%s3714_s5 + $0x58] sm:$0xff] }
 0x1c9   :  { %2216 = vmatpush3.msra.mxu1 %v1242_v13  ;;  %v1225_v13 = vld [vmem:[%s3714_s5 + $0xd0] sm:$0xff] }
 0x1ca   :  { %2217 = vmatprep.subr.mxu1 %v1257_v14  ;;  %v1209_v14 = vld [vmem:[%s3714_s5 + $0x50] sm:$0xff] }
 0x1cb   :  { %2218 = vmatpush3.msra.mxu1 %v1241_v15  ;;  %v1224_v15 = vld [vmem:[%s3714_s5 + $0xc8] sm:$0xff] }
 0x1cc   :  { %2219 = vmatprep.subr.mxu1 %v1256_v16  ;;  %v1208_v16 = vld [vmem:[%s3714_s5 + $0x48] sm:$0xff] }
 0x1cd   :  { %2220 = vmatpush3.msra.mxu1 %v1240_v17  ;;  %v1223_v17 = vld [vmem:[%s3714_s5 + $0xc0] sm:$0xff] }
 0x1ce   :  { %2221 = vmatprep.subr.mxu1 %v1255_v18  ;;  %v1207_v18 = vld [vmem:[%s3714_s5 + $0x40] sm:$0xff] }
 0x1cf   :  { %2222 = vmatpush3.msra.mxu1 %v1239_v19  ;;  %v1222_v19 = vld [vmem:[%s3714_s5 + $0xb8] sm:$0xff] }
 0x1d0   :  { %2223 = vmatprep.subr.mxu1 %v1254_v20  ;;  %v1206_v20 = vld [vmem:[%s3714_s5 + $0x38] sm:$0xff] }
 0x1d1   :  { %2224 = vmatpush3.msra.mxu1 %v1238_v22  ;;  %v1221_v22 = vld [vmem:[%s3714_s5 + $0xb0] sm:$0xff] }
 0x1d2   :  { %2225 = vmatprep.subr.mxu1 %v1253_v23  ;;  %v1205_v23 = vld [vmem:[%s3714_s5 + $0x30] sm:$0xff] }
 0x1d3   :  { %2226 = vmatpush3.msra.mxu1 %v1237_v25  ;;  %v1220_v25 = vld [vmem:[%s3714_s5 + $0xa8] sm:$0xff] }
 0x1d4   :  { %2227 = vmatprep.subr.mxu1 %v1252_v28  ;;  %v1204_v28 = vld [vmem:[%s3714_s5 + $0x28] sm:$0xff] }
 0x1d5   :  { %2228 = vmatpush3.msra.mxu1 %v1236_v29  ;;  %v1219_v29 = vld [vmem:[%s3714_s5 + $0xa0] sm:$0xff] }
 0x244   :  { %v2099_v36 = vpop.f32.mrf.mxu0 }
 0x246   :  { %v2134_v37 = vpop.f32.mrf.mxu1  ;;  %v2100_v38 = vpop.f32.mrf.mxu0 }
 0x247   :  { %v2101_v42 = vadd.f32 %v2100_v38, %v2099_v36  ;;  %v1203_v36 = vld [vmem:[%s3714_s5 + $0x20] sm:$0xff]  ;;  %v1202_v38 = vld [vmem:[%s3714_s5 + $0x18] sm:$0xff] }
 0x248   :  { %v2135_v40 = vpop.f32.mrf.mxu1 }
 0x249   :  { %v2136_v30 = vadd.f32 %v2135_v40, %v2134_v37  ;;  %v1218_v37 = vld [vmem:[%s3714_s5 + $0x98] sm:$0xff]  ;;  %v1201_v40 = vld [vmem:[%s3714_s5 + $0x10] sm:$0xff] }
 0x24b   :  { %v710_v44 = vadd.f32 %v2136_v30, %v2101_v42  ;;  %v1216_v42 = vld [vmem:[%s3714_s5 + $0x88] sm:$0xff]  ;;  %v1235_v30 = vld [vmem:[%s3714_s5 + $0x120] sm:$0xff] }
 0x266   :  { %v2169_v39 = vpop.f32.mrf.mxu0 }
 0x268   :  { %v2170_v41 = vpop.f32.mrf.mxu0 }
 0x269   :  { %v2171_v43 = vadd.f32 %v2170_v41, %v2169_v39  ;;  %v1217_v39 = vld [vmem:[%s3714_s5 + $0x90] sm:$0xff]  ;;  %v1251_v41 = vld [vmem:[%s3714_s5 + $0x1a0] sm:$0xff] }
 0x26a   :  { %2229 = vmatprep.subr.mxu1 %v1251_v41  ;;  %v1282_v41 = vld [vmem:[%s3714_s5 + $0x298] sm:$0xff] }
 0x26b   :  { %v780_v31 = vadd.f32 %v2171_v43, %v710_v44  ;;  %2230 = vmatpush3.msra.mxu1 %v1235_v30  ;;  %v1200_v43 = vld [vmem:[%s3714_s5 + $0x8] sm:$0xff]  ;;  %v1250_v44 = vld [vmem:[%s3714_s5 + $0x198] sm:$0xff] }
 0x26c   :  { %2231 = vmatprep.subr.mxu1 %v1250_v44  ;;  %v1266_v30 = vld [vmem:[%s3714_s5 + $0x218] sm:$0xff]  ;;  %v1300_v44 = vld [vmem:[%s3714_s5 + $0x328] sm:$0xff] }
 0x280   :  { %v849_v46 = vpop.f32.mrf.mxu1 }
 0x281   :  { %v850_v34 = vadd.f32 %v849_v46, %v780_v31  ;;  %v1215_v31 = vld [vmem:[%s3714_s5 + $0x80] sm:$0xff]  ;;  %v1234_v46 = vld [vmem:[%s3714_s5 + $0x118] sm:$0xff] }
 0x282   :  { %v851_v35 = vpop.f32.mrf.mxu1  ;;  %2232 = vmatpush3.msra.mxu1 %v1234_v46  ;;  %v1280_v46 = vld [vmem:[%s3714_s5 + $0x288] sm:$0xff] }
 0x283   :  { %2321 = vrcp.f32 %v850_v34  ;;  %v1199_v34 = vld [vmem:[%s3714_s5] sm:$0xff]  ;;  %v1249_v35 = vld [vmem:[%s3714_s5 + $0x190] sm:$0xff] }
 0x284   :  { %2233 = vmatprep.subr.mxu1 %v1249_v35  ;;  %v1264_v35 = vld [vmem:[%s3714_s5 + $0x208] sm:$0xff] }
 0x290   :  { %v2322_v27 = vpop.eup %2321 }
 0x291   :  { %2038 = vmatmul.mubr.msk.f32.vlgmr.msra.gmra.mxu0 %vm878_vm3, %v2322_v27 }
 0x292   :  { %2040 = vmatpush1.msk.msra.mxu0 %vm882_vm2, %v872_v47  ;;  %1042 = vmatprep.mubr.f32.mxu0 %v2373_v21  ;;  %v1233_v47 = vld [vmem:[%s3714_s5 + $0x110] sm:$0xff] }
 0x293   :  { %1006 = vmatprep.subr.mxu0 %v865_v24  ;;  %v1248_v24 = vld [vmem:[%s3714_s5 + $0x188] sm:$0xff]  ;;  %2234 = vmatpush3.msra.mxu1 %v1233_v47  ;;  %v1279_v47 = vld [vmem:[%s3714_s5 + $0x280] sm:$0xff] }
 0x294   :  { %1007 = vmatpush1.msra.mxu0 %v864_v49  ;;  %2235 = vmatprep.subr.mxu1 %v1248_v24  ;;  %v1232_v49 = vld [vmem:[%s3714_s5 + $0x108] sm:$0xff]  ;;  %v1263_v24 = vld [vmem:[%s3714_s5 + $0x200] sm:$0xff] }
 0x295   :  { %1008 = vmatprep.subr.mxu0 %v857_v51  ;;  %v1247_v51 = vld [vmem:[%s3714_s5 + $0x180] sm:$0xff]  ;;  %2236 = vmatpush3.msra.mxu1 %v1232_v49 }
 0x296   :  { %1009 = vmatpush1.msra.mxu0 %v856_v52  ;;  %v1231_v52 = vld [vmem:[%s3714_s5 + $0x100] sm:$0xff]  ;;  %2237 = vmatprep.subr.mxu1 %v1247_v51  ;;  %v1297_v51 = vld [vmem:[%s3714_s5 + $0x310] sm:$0xff] }
 0x297   :  { %2041 = vmatmul.mubr.msk.f32.vlgmr.msra.gmra.mxu0 %vm878_vm3, %v2322_v27  ;;  %2042 = vmatprep.subr.msk.mxu0 %vm882_vm2, %v875_v54 }
 0x298   :  { %2043 = vmatpush1.msk.msra.mxu0 %vm882_vm2, %v874_v55  ;;  %1113 = vmatprep.mubr.f32.mxu0 %v2373_v21 }
 0x299   :  { %1077 = vmatprep.subr.mxu0 %v867_v57  ;;  %2238 = vmatpush3.msra.mxu1 %v1231_v52  ;;  %v1296_v52 = vld [vmem:[%s3714_s5 + $0x308] sm:$0xff] }
 0x29a   :  { %1078 = vmatpush1.msra.mxu0 %v866_v58  ;;  %1537 = vmatprep.subr.mxu1 %v2373_v21 }
 0x29b   :  { %1079 = vmatprep.subr.mxu0 %v859_v59  ;;  %v1278_v59 = vld [vmem:[%s3714_s5 + $0x278] sm:$0xff] }
 0x29c   :  { %1080 = vmatpush1.msra.mxu0 %v858_v60  ;;  %v1293_v60 = vld [vmem:[%s3714_s5 + $0x2f0] sm:$0xff] }
 0x29d   :  { %2044 = vmatmul.mubr.msk.f32.vlgmr.msra.gmra.mxu0 %vm878_vm3, %v2322_v27  ;;  %2045 = vmatprep.subr.msk.mxu0 %vm882_vm2, %v877_v62 }
 0x29e   :  { %2046 = vmatpush1.msk.msra.mxu0 %vm882_vm2, %v876_v63  ;;  %1184 = vmatprep.mubr.f32.mxu0 %v2373_v21  ;;  %v1277_v63 = vld [vmem:[%s3714_s5 + $0x270] sm:$0xff] }
 0x29f   :  { %1148 = vmatprep.subr.mxu0 %v869_v0  ;;  %v1276_v0 = vld [vmem:[%s3714_s5 + $0x268] sm:$0xff] }
 0x2a0   :  { %1149 = vmatpush1.msra.mxu0 %v868_v1 }
 0x2a1   :  { %1150 = vmatprep.subr.mxu0 %v861_v2  ;;  %v1291_v2 = vld [vmem:[%s3714_s5 + $0x2e0] sm:$0xff] }
 0x2a2   :  { %1151 = vmatpush1.msra.mxu0 %v860_v26 }
 0x2a3   :  { %2047 = vmatmul.mubr.msk.f32.vlgmr.msra.gmra.mxu0 %vm878_vm3, %v2322_v27  ;;  %2172 = vmatprep.subr.mxu0 %v1230_v3  ;;  %v1294_v27 = vld [vmem:[%s3714_s5 + $0x2f8] sm:$0xff] }
 0x2a4   :  { %2173 = vmatpush3.msra.mxu0 %v1214_v4  ;;  %v1310_v3 = vld [vmem:[%s3714_s5 + $0x378] sm:$0xff]  ;;  %v1275_v4 = vld [vmem:[%s3714_s5 + $0x260] sm:$0xff] }
 0x2a5   :  { %2174 = vmatprep.subr.mxu0 %v1229_v5 }
 0x2a6   :  { %2175 = vmatpush3.msra.mxu0 %v1213_v6  ;;  %v1274_v6 = vld [vmem:[%s3714_s5 + $0x258] sm:$0xff] }
 0x2a7   :  { %2176 = vmatprep.subr.mxu0 %v1228_v7  ;;  %v1289_v7 = vld [vmem:[%s3714_s5 + $0x2d0] sm:$0xff] }
 0x2a8   :  { %2177 = vmatpush3.msra.mxu0 %v1212_v8 }
 0x2a9   :  { %2178 = vmatprep.subr.mxu0 %v1227_v9  ;;  %v1308_v9 = vld [vmem:[%s3714_s5 + $0x368] sm:$0xff] }
 0x2aa   :  { %2179 = vmatpush3.msra.mxu0 %v1211_v10  ;;  %v1273_v10 = vld [vmem:[%s3714_s5 + $0x250] sm:$0xff] }
 0x2ab   :  { %2180 = vmatprep.subr.mxu0 %v1226_v11 }
 0x2ac   :  { %2181 = vmatpush3.msra.mxu0 %v1210_v12  ;;  %v1288_v12 = vld [vmem:[%s3714_s5 + $0x2c8] sm:$0xff] }
 0x2ad   :  { %2182 = vmatprep.subr.mxu0 %v1225_v13  ;;  %v1307_v13 = vld [vmem:[%s3714_s5 + $0x360] sm:$0xff] }
 0x2ae   :  { %2183 = vmatpush3.msra.mxu0 %v1209_v14  ;;  %v1272_v14 = vld [vmem:[%s3714_s5 + $0x248] sm:$0xff] }
 0x2af   :  { %2184 = vmatprep.subr.mxu0 %v1224_v15  ;;  %v1287_v15 = vld [vmem:[%s3714_s5 + $0x2c0] sm:$0xff] }
 0x2b0   :  { %2185 = vmatpush3.msra.mxu0 %v1208_v16  ;;  %v1306_v16 = vld [vmem:[%s3714_s5 + $0x358] sm:$0xff] }
 0x2b1   :  { %2186 = vmatprep.subr.mxu0 %v1223_v17  ;;  %v1271_v17 = vld [vmem:[%s3714_s5 + $0x240] sm:$0xff] }
 0x2b2   :  { %2187 = vmatpush3.msra.mxu0 %v1207_v18 }
 0x2b3   :  { %2188 = vmatprep.subr.mxu0 %v1222_v19  ;;  %v1286_v19 = vld [vmem:[%s3714_s5 + $0x2b8] sm:$0xff] }
 0x2b4   :  { %2189 = vmatpush3.msra.mxu0 %v1206_v20  ;;  %v1305_v20 = vld [vmem:[%s3714_s5 + $0x350] sm:$0xff] }
 0x2b5   :  { %2190 = vmatprep.subr.mxu0 %v1221_v22 }
 0x2b6   :  { %2191 = vmatpush3.msra.mxu0 %v1205_v23  ;;  %v1270_v23 = vld [vmem:[%s3714_s5 + $0x238] sm:$0xff] }
 0x2b7   :  { %2192 = vmatprep.subr.mxu0 %v1220_v25  ;;  %v1285_v25 = vld [vmem:[%s3714_s5 + $0x2b0] sm:$0xff] }
 0x2b8   :  { %2193 = vmatpush3.msra.mxu0 %v1204_v28  ;;  %v1304_v28 = vld [vmem:[%s3714_s5 + $0x348] sm:$0xff] }
 0x2b9   :  { %2194 = vmatprep.subr.mxu0 %v1219_v29  ;;  %v1284_v29 = vld [vmem:[%s3714_s5 + $0x2a8] sm:$0xff] }
 0x2ba   :  { %2195 = vmatpush3.msra.mxu0 %v1203_v36  ;;  %v1303_v36 = vld [vmem:[%s3714_s5 + $0x340] sm:$0xff] }
 0x2bb   :  { %2196 = vmatprep.subr.mxu0 %v1218_v37  ;;  %v1268_v37 = vld [vmem:[%s3714_s5 + $0x228] sm:$0xff] }
 0x2bc   :  { %2197 = vmatpush3.msra.mxu0 %v1202_v38  ;;  %v1283_v38 = vld [vmem:[%s3714_s5 + $0x2a0] sm:$0xff] }
 0x2bd   :  { %2198 = vmatprep.subr.mxu0 %v1217_v39  ;;  %v1302_v39 = vld [vmem:[%s3714_s5 + $0x338] sm:$0xff] }
 0x2be   :  { %2199 = vmatpush3.msra.mxu0 %v1201_v40  ;;  %v1267_v40 = vld [vmem:[%s3714_s5 + $0x220] sm:$0xff] }
 0x2bf   :  { %2200 = vmatprep.subr.mxu0 %v1216_v42  ;;  %v1301_v42 = vld [vmem:[%s3714_s5 + $0x330] sm:$0xff] }
 0x2c0   :  { %2201 = vmatpush3.msra.mxu0 %v1200_v43  ;;  %v1281_v43 = vld [vmem:[%s3714_s5 + $0x290] sm:$0xff] }
 0x2c1   :  { %2202 = vmatprep.subr.mxu0 %v1215_v31  ;;  %v1265_v31 = vld [vmem:[%s3714_s5 + $0x210] sm:$0xff] }
 0x2c2   :  { %2203 = vmatpush3.msra.mxu0 %v1199_v34  ;;  %v1299_v34 = vld [vmem:[%s3714_s5 + $0x320] sm:$0xff] }
 0x2c3   :  { %2242 = vmatprep.subr.mxu0 %v1294_v27  ;;  %v1298_v27 = vld [vmem:[%s3714_s5 + $0x318] sm:$0xff] }
 0x351   :  { %v973_v54 = vpop.f32.mrf.mxu0 }
 0x352   :  { %v1191_v58 = vmul.f32 %v2790_v32, %v973_v54  ;;  %v1292_v32 = vld [vmem:[%s3714_s5 + $0x2e8] sm:$0xff]  ;;  %v1323_v54 = vld [vmem:[%s3714_s5 + $0x3e0] sm:$0xff] }
 0x353   :  { %v975_v55 = vpop.f32.mrf.mxu0 }
 0x354   :  { %v1192_v57 = vmul.f32 %v2792_v33, %v975_v55  ;;  %v1322_v55 = vld [vmem:[%s3714_s5 + $0x3d8] sm:$0xff] }
 0x356   :  { %1391 = vmatprep.mubr.f32.mxu0 %v1192_v57  ;;  %v1321_v57 = vld [vmem:[%s3714_s5 + $0x3d0] sm:$0xff] }
 0x357   :  { %v1044_v62 = vpop.f32.mrf.mxu0  ;;  %1392 = vmatmul.mubr.f32.vlgmr.msra.gmra.mxu0 %v1191_v58  ;;  %v1320_v58 = vld [vmem:[%s3714_s5 + $0x3c8] sm:$0xff] }
 0x358   :  { %2243 = vmatpush3.msra.mxu0 %v1278_v59  ;;  %v1193_v26 = vmul.f32 %v2797_v48, %v1044_v62  ;;  %v1309_v48 = vld [vmem:[%s3714_s5 + $0x370] sm:$0xff]  ;;  %v1319_v59 = vld [vmem:[%s3714_s5 + $0x3c0] sm:$0xff] }
 0x359   :  { %v1046_v33 = vpop.f32.mrf.mxu0  ;;  %2244 = vmatprep.subr.mxu0 %v1293_v60  ;;  %v1318_v60 = vld [vmem:[%s3714_s5 + $0x3b8] sm:$0xff]  ;;  %v1317_v62 = vld [vmem:[%s3714_s5 + $0x3b0] sm:$0xff] }
 0x35a   :  { %v1194_v1 = vmul.f32 %v2803_v50, %v1046_v33  ;;  %2245 = vmatpush3.msra.mxu0 %v1277_v63  ;;  %v1290_v50 = vld [vmem:[%s3714_s5 + $0x2d8] sm:$0xff]  ;;  %v1316_v63 = vld [vmem:[%s3714_s5 + $0x3a8] sm:$0xff] }
 0x35b   :  { %2246 = vmatprep.subr.mxu0 %v1292_v32  ;;  %v1315_v32 = vld [vmem:[%s3714_s5 + $0x3a0] sm:$0xff]  ;;  %v1314_v33 = vld [vmem:[%s3714_s5 + $0x398] sm:$0xff] }
 0x35c   :  { %1461 = vmatprep.mubr.f32.mxu1 %v1194_v1  ;;  %2247 = vmatpush3.msra.mxu0 %v1276_v0  ;;  %v1313_v0 = vld [vmem:[%s3714_s5 + $0x390] sm:$0xff]  ;;  %v1312_v1 = vld [vmem:[%s3714_s5 + $0x388] sm:$0xff] }
 0x35d   :  { %v3342_v5 = vpop.f32.mrf.mxu0  ;;  %1462 = vmatmul.mubr.f32.vlgmr.msra.gmra.mxu1 %v1193_v26  ;;  %2248 = vmatprep.subr.mxu0 %v1291_v2  ;;  %v1311_v2 = vld [vmem:[%s3714_s5 + $0x380] sm:$0xff] }
 0x35e   :  { %1538 = vmatpush1.msra.mxu1 %v1310_v3  ;;  %2249 = vmatpush3.msra.mxu0 %v1275_v4  ;;  %v1195_v49 = vmul.f32 %v2970_v45, %v3342_v5  ;;  %v1295_v45 = vld [vmem:[%s3714_s5 + $0x300] sm:$0xff]  ;;  %v1650_v3 = vld [vmem:[%s3715_s6 + $0x158] sm:$0x3]  ;;  %v1649_v4 = vld [vmem:[%s3715_s6 + $0x150] sm:$0x3] }
 0x35f   :  { %1539 = vmatprep.subr.mxu1 %v2373_v21  ;;  %v1117_v8 = vpop.f32.mrf.mxu0  ;;  %2250 = vmatprep.subr.mxu0 %v1290_v50  ;;  %v1643_v50 = vld [vmem:[%s3715_s6 + $0x120] sm:$0xff]  ;;  %v1642_v5 = vld [vmem:[%s3715_s6 + $0x118] sm:$0xff] }
 0x360   :  { %v1196_v11 = vmul.f32 %v2813_v53, %v1117_v8  ;;  %1540 = vmatpush1.msra.mxu1 %v1309_v48  ;;  %2251 = vmatpush3.msra.mxu0 %v1274_v6  ;;  %v1636_v48 = vld [vmem:[%s3715_s6 + $0xe8] sm:$0xff]  ;;  %v1641_v8 = vld [vmem:[%s3715_s6 + $0x110] sm:$0xff] }
 0x361   :  { %1541 = vmatprep.subr.mxu1 %v2373_v21  ;;  %2252 = vmatprep.subr.mxu0 %v1289_v7  ;;  %v1648_v6 = vld [vmem:[%s3715_s6 + $0x148] sm:$0xff]  ;;  %v1635_v7 = vld [vmem:[%s3715_s6 + $0xe0] sm:$0xff] }
 0x362   :  { %1542 = vmatpush1.msra.mxu1 %v1308_v9  ;;  %2253 = vmatpush3.msra.mxu0 %v1273_v10  ;;  %v1629_v9 = vld [vmem:[%s3715_s6 + $0xb0] sm:$0xff]  ;;  %v1628_v10 = vld [vmem:[%s3715_s6 + $0xa8] sm:$0xff] }
 0x363   :  { %1531 = vmatprep.mubr.f32.mxu0 %v1196_v11  ;;  %1543 = vmatprep.subr.mxu1 %v2373_v21  ;;  %v3372_v53 = vpop.f32.mrf.mxu0  ;;  %v1634_v11 = vld [vmem:[%s3715_s6 + $0xd8] sm:$0xff] }
 0x364   :  { %2254 = vmatprep.subr.mxu0 %v1288_v12  ;;  %1544 = vmatpush1.msra.mxu1 %v1307_v13  ;;  %v1197_v26 = vmul.f32 %v3025_v61, %v3372_v53  ;;  %v1655_v61 = vld [vmem:[%s3715_s6 + $0x180] sm:$0x3]  ;;  %v1622_v12 = vld [vmem:[%s3715_s6 + $0x78] sm:$0xff]  ;;  %v1621_v13 = vld [vmem:[%s3715_s6 + $0x70] sm:$0xff] }
 0x365   :  { %2255 = vmatpush3.msra.mxu0 %v1272_v14  ;;  %1545 = vmatprep.subr.mxu1 %v2373_v21  ;;  %v1188_v18 = vpop.f32.mrf.mxu0  ;;  %v1627_v14 = vld [vmem:[%s3715_s6 + $0xa0] sm:$0xff] }
 0x366   :  { %v1198_v22 = vmul.f32 %v2823_v56, %v1188_v18  ;;  %2256 = vmatprep.subr.mxu0 %v1287_v15  ;;  %1546 = vmatpush1.msra.mxu1 %v1306_v16  ;;  %v1269_v56 = vld [vmem:[%s3714_s5 + $0x230] sm:$0xff]  ;;  %v1615_v53 = vld [vmem:[%s3715_s6 + $0x40] sm:$0xff]  ;;  %v1614_v15 = vld [vmem:[%s3715_s6 + $0x38] sm:$0xff] }
 0x367   :  { %2257 = vmatpush3.msra.mxu0 %v1271_v17  ;;  %1547 = vmatprep.subr.mxu1 %v2373_v21  ;;  %v1608_v16 = vld [vmem:[%s3715_s6 + $0x8] sm:$0xff]  ;;  %v1607_v18 = vld [vmem:[%s3715_s6] sm:$0xff] }
 0x368   :  { %2258 = vmatprep.subr.mxu0 %v1286_v19  ;;  %1548 = vmatpush1.msra.mxu1 %v1305_v20  ;;  %v1620_v17 = vld [vmem:[%s3715_s6 + $0x68] sm:$0xff]  ;;  %v1613_v20 = vld [vmem:[%s3715_s6 + $0x30] sm:$0xff] }
 0x369   :  { %2259 = vmatpush3.msra.mxu0 %v1270_v23  ;;  %1549 = vmatprep.subr.mxu1 %v2373_v21  ;;  %v1652_v19 = vld [vmem:[%s3715_s6 + $0x168] sm:$0x3] }
 0x36a   :  { %2048 = vmatprep.mubr.msk.f32.mxu1 %vm405_vm1, %v1198_v22  ;;  %2260 = vmatprep.subr.mxu0 %v1285_v25 }
 0x36b   :  { %1550 = vmatpush1.msra.mxu1 %v1304_v28  ;;  %2261 = vmatpush3.msra.mxu0 %v1269_v56 }
 0x36c   :  { %1551 = vmatprep.subr.mxu1 %v2373_v21  ;;  %2262 = vmatprep.subr.mxu0 %v1284_v29 }
 0x36d   :  { %1552 = vmatpush1.msra.mxu1 %v1303_v36  ;;  %2263 = vmatpush3.msra.mxu0 %v1268_v37 }
 0x36e   :  { %1553 = vmatprep.subr.mxu1 %v2373_v21  ;;  %2264 = vmatprep.subr.mxu0 %v1283_v38 }
 0x36f   :  { %1554 = vmatpush1.msra.mxu1 %v1302_v39  ;;  %2265 = vmatpush3.msra.mxu0 %v1267_v40 }
 0x370   :  { %1555 = vmatprep.subr.mxu1 %v2373_v21  ;;  %2266 = vmatprep.subr.mxu0 %v1282_v41 }
 0x371   :  { %1556 = vmatpush1.msra.mxu1 %v1301_v42  ;;  %2267 = vmatpush3.msra.mxu0 %v1266_v30  ;;  %v1651_v30 = vld [vmem:[%s3715_s6 + $0x160] sm:$0x3] }
 0x372   :  { %1557 = vmatprep.subr.mxu1 %v2373_v21  ;;  %2268 = vmatprep.subr.mxu0 %v1281_v43 }
 0x373   :  { %1558 = vmatpush1.msra.mxu1 %v1300_v44  ;;  %2269 = vmatpush3.msra.mxu0 %v1265_v31  ;;  %v1645_v44 = vld [vmem:[%s3715_s6 + $0x130] sm:$0xff]  ;;  %v1644_v31 = vld [vmem:[%s3715_s6 + $0x128] sm:$0xff] }
 0x374   :  { %1559 = vmatprep.subr.mxu1 %v2373_v21  ;;  %2270 = vmatprep.subr.mxu0 %v1280_v46  ;;  %v1638_v46 = vld [vmem:[%s3715_s6 + $0xf8] sm:$0xff] }
 0x375   :  { %1560 = vmatpush1.msra.mxu1 %v1299_v34  ;;  %2271 = vmatpush3.msra.mxu0 %v1264_v35  ;;  %v1637_v34 = vld [vmem:[%s3715_s6 + $0xf0] sm:$0xff]  ;;  %v1631_v35 = vld [vmem:[%s3715_s6 + $0xc0] sm:$0xff] }
 0x376   :  { %1561 = vmatprep.subr.mxu1 %v2373_v21  ;;  %2272 = vmatprep.subr.mxu0 %v1279_v47  ;;  %v1630_v47 = vld [vmem:[%s3715_s6 + $0xb8] sm:$0xff] }
 0x377   :  { %1562 = vmatpush1.msra.mxu1 %v1298_v27  ;;  %2273 = vmatpush3.msra.mxu0 %v1263_v24  ;;  %v1624_v27 = vld [vmem:[%s3715_s6 + $0x88] sm:$0xff]  ;;  %v1623_v24 = vld [vmem:[%s3715_s6 + $0x80] sm:$0xff] }
 0x378   :  { %1563 = vmatprep.subr.mxu1 %v2373_v21  ;;  %1532 = vmatmul.mubr.f32.vlgmr.msra.gmra.mxu0 %v1195_v49  ;;  %v1617_v49 = vld [vmem:[%s3715_s6 + $0x50] sm:$0xff] }
 0x379   :  { %1564 = vmatpush1.msra.mxu1 %v1297_v51  ;;  %1748 = vmatprep.mubr.f32.mxu0 %v2373_v21  ;;  %v1616_v51 = vld [vmem:[%s3715_s6 + $0x48] sm:$0xff] }
 0x37a   :  { %1565 = vmatprep.subr.mxu1 %v2373_v21  ;;  %2049 = vmatprep.subr.msk.mxu0 %vm1662_vm4, %v1650_v3 }
 0x37b   :  { %1566 = vmatpush1.msra.mxu1 %v1296_v52  ;;  %2050 = vmatpush1.msk.msra.mxu0 %vm1662_vm4, %v1649_v4  ;;  %v1610_v52 = vld [vmem:[%s3715_s6 + $0x18] sm:$0xff] }
 0x37c   :  { %1567 = vmatprep.subr.mxu1 %v2373_v21  ;;  %1704 = vmatprep.subr.mxu0 %v1643_v50 }
 0x37d   :  { %1568 = vmatpush1.msra.mxu1 %v1295_v45  ;;  %1705 = vmatpush1.msra.mxu0 %v1642_v5  ;;  %v1609_v45 = vld [vmem:[%s3715_s6 + $0x10] sm:$0xff] }
 0x37e   :  { %1575 = vmatprep.subr.mxu1 %v2373_v21  ;;  %1706 = vmatprep.subr.mxu0 %v1636_v48 }
 0x37f   :  { %1576 = vmatpush2.msra.mxu1 %v1323_v54  ;;  %1707 = vmatpush1.msra.mxu0 %v1635_v7  ;;  %v1654_v54 = vld [vmem:[%s3715_s6 + $0x178] sm:$0x3] }
 0x380   :  { %1577 = vmatprep.subr.mxu1 %v2373_v21  ;;  %1708 = vmatprep.subr.mxu0 %v1629_v9 }
 0x381   :  { %1578 = vmatpush2.msra.mxu1 %v1322_v55  ;;  %1709 = vmatpush1.msra.mxu0 %v1628_v10  ;;  %v1653_v55 = vld [vmem:[%s3715_s6 + $0x170] sm:$0x3] }
 0x382   :  { %1579 = vmatprep.subr.mxu1 %v2373_v21  ;;  %1710 = vmatprep.subr.mxu0 %v1622_v12 }
 0x383   :  { %1580 = vmatpush2.msra.mxu1 %v1321_v57  ;;  %1711 = vmatpush1.msra.mxu0 %v1621_v13  ;;  %v1647_v57 = vld [vmem:[%s3715_s6 + $0x140] sm:$0xff] }
 0x384   :  { %1581 = vmatprep.subr.mxu1 %v2373_v21  ;;  %1712 = vmatprep.subr.mxu0 %v1615_v53 }
 0x385   :  { %1582 = vmatpush2.msra.mxu1 %v1320_v58  ;;  %1713 = vmatpush1.msra.mxu0 %v1614_v15  ;;  %v1646_v58 = vld [vmem:[%s3715_s6 + $0x138] sm:$0xff] }
 0x386   :  { %1583 = vmatprep.subr.mxu1 %v2373_v21  ;;  %1714 = vmatprep.subr.mxu0 %v1608_v16 }
 0x387   :  { %1584 = vmatpush2.msra.mxu1 %v1319_v59  ;;  %1715 = vmatpush1.msra.mxu0 %v1607_v18  ;;  %v1640_v59 = vld [vmem:[%s3715_s6 + $0x108] sm:$0xff] }
 0x388   :  { %1585 = vmatprep.subr.mxu1 %v2373_v21  ;;  %2052 = vmatprep.subr.msk.mxu0 %vm1662_vm4, %v1652_v19 }
 0x389   :  { %1586 = vmatpush2.msra.mxu1 %v1318_v60  ;;  %v1639_v60 = vld [vmem:[%s3715_s6 + $0x100] sm:$0xff] }
 0x38a   :  { %1587 = vmatprep.subr.mxu1 %v2373_v21 }
 0x38b   :  { %1588 = vmatpush2.msra.mxu1 %v1317_v62  ;;  %v1633_v62 = vld [vmem:[%s3715_s6 + $0xd0] sm:$0xff] }
 0x38c   :  { %1589 = vmatprep.subr.mxu1 %v2373_v21 }
 0x38d   :  { %1590 = vmatpush2.msra.mxu1 %v1316_v63  ;;  %v1632_v63 = vld [vmem:[%s3715_s6 + $0xc8] sm:$0xff] }
 0x38e   :  { %1591 = vmatprep.subr.mxu1 %v2373_v21 }
 0x38f   :  { %1592 = vmatpush2.msra.mxu1 %v1315_v32  ;;  %v1625_v32 = vld [vmem:[%s3715_s6 + $0x90] sm:$0xff] }
 0x390   :  { %1593 = vmatprep.subr.mxu1 %v2373_v21 }
 0x391   :  { %1594 = vmatpush2.msra.mxu1 %v1314_v33  ;;  %v1619_v33 = vld [vmem:[%s3715_s6 + $0x60] sm:$0xff] }
 0x392   :  { %1595 = vmatprep.subr.mxu1 %v2373_v21 }
 0x393   :  { %1596 = vmatpush2.msra.mxu1 %v1313_v0  ;;  %v1618_v0 = vld [vmem:[%s3715_s6 + $0x58] sm:$0xff] }
 0x394   :  { %1597 = vmatprep.subr.mxu1 %v2373_v21 }
 0x395   :  { %1598 = vmatpush2.msra.mxu1 %v1312_v1  ;;  %v1612_v1 = vld [vmem:[%s3715_s6 + $0x28] sm:$0xff] }
 0x396   :  { %1599 = vmatprep.subr.mxu1 %v2373_v21 }
 0x397   :  { %1600 = vmatpush2.msra.mxu1 %v1311_v2  ;;  %v1611_v2 = vld [vmem:[%s3715_s6 + $0x20] sm:$0xff] }
 0x398   :  { %1602 = vmatmul.mubr.f32.vlgmr.msra.gmra.mxu1 %v1197_v26  ;;  %2285 = vmatprep.subr.mxu1 %v2373_v21  ;;  %v1657_v26 = vstv %s3716_s7 }
 0x399   :  { %2286 = vmatpush3.msk.msra.mxu1 %vm1662_vm4, %v1655_v61  ;;  %2299 = vmatprep.mubr.msk.f32.mxu1 %vm2374_vm5, %v2373_v21 }
 0x39a   :  { %2287 = vmatprep.subr.mxu1 %v2373_v21 }
 0x39b   :  { %2288 = vmatpush3.msra.mxu1 %v1648_v6 }
 0x39c   :  { %2289 = vmatprep.subr.mxu1 %v2373_v21 }
 0x39d   :  { %2290 = vmatpush3.msra.mxu1 %v1641_v8 }
 0x39e   :  { %2291 = vmatprep.subr.mxu1 %v2373_v21 }
 0x39f   :  { %2292 = vmatpush3.msra.mxu1 %v1634_v11 }
 0x3a0   :  { %2293 = vmatprep.subr.mxu1 %v2373_v21 }
 0x3a1   :  { %2294 = vmatpush3.msra.mxu1 %v1627_v14 }
 0x3a2   :  { %2295 = vmatprep.subr.mxu1 %v2373_v21 }
 0x3a3   :  { %2296 = vmatpush3.msra.mxu1 %v1620_v17 }
 0x3a4   :  { %2297 = vmatprep.subr.mxu1 %v2373_v21 }
 0x3a5   :  { %2298 = vmatpush3.msra.mxu1 %v1613_v20 }
 0x417   :  { %v2204_v22 = vpop.f32.mrf.mxu0 }
 0x419   :  { %v2205_v23 = vpop.f32.mrf.mxu0 }
 0x41a   :  { %v2206_v37 = vadd.f32 %v2205_v23, %v2204_v22 }
 0x41d   :  { %v2239_v25 = vpop.f32.mrf.mxu1 }
 0x41f   :  { %v2240_v56 = vpop.f32.mrf.mxu1 }
 0x420   :  { %v2241_v36 = vadd.f32 %v2240_v56, %v2239_v25 }
 0x422   :  { %v1464_v39 = vadd.f32 %v2241_v36, %v2206_v37 }
 0x438   :  { %v2274_v28 = vpop.f32.mrf.mxu0 }
 0x43a   :  { %v2275_v29 = vpop.f32.mrf.mxu0 }
 0x43b   :  { %v2276_v38 = vadd.f32 %v2275_v29, %v2274_v28 }
 0x43d   :  { %v1534_v40 = vadd.f32 %v2276_v38, %v1464_v39 }
 0x458   :  { %v1603_v41 = vpop.f32.mrf.mxu1 }
 0x459   :  { %v1604_v42 = vadd.f32 %v1603_v41, %v1534_v40 }
 0x45a   :  { %v1605_v43 = vpop.f32.mrf.mxu1 }
 0x45b   :  { %2051 = vmatmul.mubr.msk.f32.vlgmr.msra.gmra.mxu0 %vm1658_vm6, %v1604_v42  ;;  %2300 = vmatmul.mubr.msk.f32.vlgmr.msra.gmra.mxu1 %vm1658_vm6, %v1604_v42 }
 0x45c   :  { %2053 = vmatpush1.msk.msra.mxu0 %vm1662_vm4, %v1651_v30  ;;  %1819 = vmatprep.mubr.f32.mxu0 %v2373_v21 }
 0x45d   :  { %1775 = vmatprep.subr.mxu0 %v1645_v44 }
 0x45e   :  { %1776 = vmatpush1.msra.mxu0 %v1644_v31 }
 0x45f   :  { %1777 = vmatprep.subr.mxu0 %v1638_v46 }
 0x460   :  { %1778 = vmatpush1.msra.mxu0 %v1637_v34 }
 0x461   :  { %1779 = vmatprep.subr.mxu0 %v1631_v35 }
 0x462   :  { %1780 = vmatpush1.msra.mxu0 %v1630_v47 }
 0x463   :  { %1781 = vmatprep.subr.mxu0 %v1624_v27 }
 0x464   :  { %1782 = vmatpush1.msra.mxu0 %v1623_v24 }
 0x465   :  { %1783 = vmatprep.subr.mxu0 %v1617_v49 }
 0x466   :  { %1784 = vmatpush1.msra.mxu0 %v1616_v51 }
 0x467   :  { %1785 = vmatprep.subr.mxu0 %v1610_v52 }
 0x468   :  { %1786 = vmatpush1.msra.mxu0 %v1609_v45 }
 0x469   :  { %2054 = vmatmul.mubr.msk.f32.vlgmr.msra.gmra.mxu0 %vm1658_vm6, %v1604_v42  ;;  %2055 = vmatprep.subr.msk.mxu0 %vm1662_vm4, %v1654_v54 }
 0x46a   :  { %2056 = vmatpush1.msk.msra.mxu0 %vm1662_vm4, %v1653_v55  ;;  %1890 = vmatprep.mubr.f32.mxu0 %v2373_v21  ;;  %v1626_v21 = vld [vmem:[%s3715_s6 + $0x98] sm:$0xff]  ;;  %s2375_s6 = smov [#allocation3]  }
 0x46b   :  { %1846 = vmatprep.subr.mxu0 %v1647_v57  ;;  %s2023_s7 = sshll.u32 %s2375_s6, 4  ;;  %s2024_s7 = int_to_ptr.vmem [resolvable:$true] %s2023_s7 }
 0x46c   :  { %1847 = vmatpush1.msra.mxu0 %v1646_v58  ;;  %s2351_s16 = scalar_lea.vmem %s2024_s7, 896  ;;  %p2356_p1 = scmp.lt.s32.totalorder %s2024_s7, %s2024_s7 }
 0x46d   :  { %1848 = vmatprep.subr.mxu0 %v1640_v59  ;;  %p2352_p0 = scmp.ne.s32.totalorder %s2024_s7, %s2351_s16  ;;  %p2357_p2 = scmp.lt.s32.totalorder %s2351_s16, %s2351_s16 }
 0x46e   :  { %1849 = vmatpush1.msra.mxu0 %v1639_v60 }
 0x46f   :  { %1850 = vmatprep.subr.mxu0 %v1633_v62  ;;  %p2358_p3 = por %p2357_p2, %p2356_p1 }
 0x470   :  { %1851 = vmatpush1.msra.mxu0 %v1632_v63 }
 0x471   :  { %1852 = vmatprep.subr.mxu0 %v1626_v21  ;;  %p2359_p4 = pnand %p2358_p3, %p2352_p0 }
 0x472   :  { %1853 = vmatpush1.msra.mxu0 %v1625_v32 }
 0x473   :  { %1854 = vmatprep.subr.mxu0 %v1619_v33 }
 0x474   :  { %1855 = vmatpush1.msra.mxu0 %v1618_v0 }
 0x475   :  { %1856 = vmatprep.subr.mxu0 %v1612_v1 }
 0x476   :  { %1857 = vmatpush1.msra.mxu0 %v1611_v2 }
 0x477   :  { %2057 = vmatmul.mubr.msk.f32.vlgmr.msra.gmra.mxu0 %vm1658_vm6, %v1604_v42 }
 0x51b   :  { %v1750_v3 = vpop.f32.mrf.mxu0  ;;  %v1963_v4 = vpop.f32.mrf.mxu1 }
 0x51c   :  { %v1751_v50 = vadd.f32 %v1750_v3, %v1657_v26  ;;  %v1964_v61 = vadd.f32 %v1963_v4, %v1657_v26 }
 0x51d   :  { %v1752_v5 = vpop.f32.mrf.mxu0  ;;  %v2301_v48 = vpop.f32.mrf.mxu1 }
 0x51e   :  { %v2060_v6 = vmul.f32 -1.442695, %v1751_v50  ;;  %v2066_v7 = vmul.f32 -1.442695, %v1964_v61  ;;  %v1753_v8 = vadd.f32 %v1752_v5, %v1657_v26 }
 0x520   :  { %2323 = vpow2.f32 %v2060_v6  ;;  %v2061_v9 = vmul.f32 -1.442695, %v1753_v8 }
 0x521   :  { %2325 = vpow2.f32 %v2066_v7 }
 0x522   :  { %2327 = vpow2.f32 %v2061_v9 }
 0x529   :  { %v1821_v10 = vpop.f32.mrf.mxu0 }
 0x52a   :  { %v1822_v11 = vadd.f32 %v1821_v10, %v1657_v26 }
 0x52b   :  { %v1823_v12 = vpop.f32.mrf.mxu0 }
 0x52c   :  { %v2062_v13 = vmul.f32 -1.442695, %v1822_v11  ;;  %v1824_v14 = vadd.f32 %v1823_v12, %v1657_v26 }
 0x52d   :  { %v2324_v53 = vpop.eup %2323 }
 0x52e   :  { %v2326_v15 = vpop.eup %2325  ;;  %v1988_v16 = vadd.f32 1.0, %v2324_v53  ;;  %2329 = vpow2.f32 %v2062_v13  ;;  %v2063_v19 = vmul.f32 -1.442695, %v1824_v14 }
 0x52f   :  { %v2328_v17 = vpop.eup %2327  ;;  %v1994_v18 = vadd.f32 1.0, %v2326_v15 }
 0x530   :  { %2331 = vrcp.f32 %v1988_v16  ;;  %v1989_v20 = vadd.f32 1.0, %v2328_v17 }
 0x531   :  { %2333 = vrcp.f32 %v1994_v18 }
 0x532   :  { %2335 = vrcp.f32 %v1989_v20 }
 0x533   :  { %2337 = vpow2.f32 %v2063_v19 }
 0x537   :  { %v1892_v22 = vpop.f32.mrf.mxu0 }
 0x538   :  { %v1893_v23 = vadd.f32 %v1892_v22, %v1657_v26 }
 0x539   :  { %v1894_v25 = vpop.f32.mrf.mxu0 }
 0x53a   :  { %v2064_v28 = vmul.f32 -1.442695, %v1893_v23  ;;  %v1895_v56 = vadd.f32 %v1894_v25, %v1657_v26 }
 0x53b   :  { %v2330_v29 = vpop.eup %2329 }
 0x53c   :  { %v1990_v36 = vadd.f32 1.0, %v2330_v29  ;;  %2339 = vpow2.f32 %v2064_v28  ;;  %v2065_v37 = vmul.f32 -1.442695, %v1895_v56 }
 0x53d   :  { %v2332_v38 = vpop.eup %2331 }
 0x53e   :  { %v2334_v39 = vpop.eup %2333  ;;  %2009 = vst [vmem:[#allocation3] sm:$0xff] %v2332_v38  ;;  %2341 = vrcp.f32 %v1990_v36 }
 0x53f   :  { %v2336_v40 = vpop.eup %2335  ;;  %2016 = vst.msk [vmem:[#allocation3 + $0x30] sm:$0xff] %vm2015_vm7, %v2334_v39  ;;  %2343 = vpow2.f32 %v2065_v37 }
 0x540   :  { %v2338_v41 = vpop.eup %2337  ;;  %2010 = vst [vmem:[#allocation3 + $0x8] sm:$0xff] %v2336_v40 }
 0x541   :  { %v1991_v42 = vadd.f32 1.0, %v2338_v41 }
 0x543   :  { %2345 = vrcp.f32 %v1991_v42 }
 0x549   :  { %v2340_v30 = vpop.eup %2339 }
 0x54a   :  { %v1992_v43 = vadd.f32 1.0, %v2340_v30 }
 0x54b   :  { %v2342_v44 = vpop.eup %2341 }
 0x54c   :  { %v2344_v31 = vpop.eup %2343  ;;  %2011 = vst [vmem:[#allocation3 + $0x10] sm:$0xff] %v2342_v44  ;;  %2347 = vrcp.f32 %v1992_v43 }
 0x54d   :  { %v1993_v46 = vadd.f32 1.0, %v2344_v31 }
 0x54f   :  { %2349 = vrcp.f32 %v1993_v46 }
 0x550   :  { %v2346_v34 = vpop.eup %2345 }
 0x551   :  { %2012 = vst [vmem:[#allocation3 + $0x18] sm:$0xff] %v2346_v34 }
 0x559   :  { %v2348_v35 = vpop.eup %2347 }
 0x55a   :  { %2013 = vst [vmem:[#allocation3 + $0x20] sm:$0xff] %v2348_v35 }
 0x55c   :  { %v2350_v47 = vpop.eup %2349 }
 0x55d   :  { %2014 = vst [vmem:[#allocation3 + $0x28] sm:$0xff] %v2350_v47 }
 0x55e   :  { %2362 = shalt.err (!%p2359_p4)
}
 0x55f   :  { %2026 = dma.vmem_to_hbm [thread:$0]  %s2024_s7, 896, %s3717_s8, [#allocation4]  }
 0x560   :  { %2371 = dma.done.wait [#allocation4], 896  }
 0x561   :  { %2372 = vsyncadd [#allocation4], 4294966400 }
 0x562   :  { %2030 = vsyncpa [#allocation4], 1 }

</bundles_post_ra>
